<compile_context>
chip_gen: v6e
topology: v6e:2x2x1
jax: 0.10.0
libtpu: 0.0.40
codegen_flags: <defaults>
</compile_context>

<pallas_src>
import jax
import jax.numpy as jnp
from jax import lax
from jax.experimental import pallas as pl
from jax.experimental.pallas import tpu as pltpu


def _round_up(x, m):
    return (x + m - 1) // m * m


def _pick_tile_n(n_cols, n_rkhs, target_bytes=2 << 20):
    """Column tile: multiple of 128, ~target_bytes of bf16 per trg block."""
    cap = max(128, (target_bytes // (max(n_rkhs, 1) * 2)) // 128 * 128)
    return int(min(cap, _round_up(n_cols, 128)))


def _make_nce_kernel(tclip, n_rkhs, L, LP):
    inv_sqrt_r = 1.0 / float(n_rkhs) ** 0.5
    inv_tclip = 1.0 / float(tclip)
    tclip = float(tclip)

    def kernel(src_ref, trg_ref, tb_ref, sel_ref, rowb_ref, out_ref,
               m_ref, s_ref, sq_ref, pos_ref):
        # src_ref : (M, R)        bf16  all source groups of this pair (rows)
        # trg_ref : (R, TILE_N)   bf16  lane-dense column tile of the target
        # tb_ref  : (1, TILE_N)   i32   target-batch id per column (-1 = pad)
        # sel_ref : (TILE_N, LP)  f32   one-hot(col -> location) selection
        # rowb_ref: (M, 1)        i32   batch id per row (row % B_pad)
        # out_ref : (M, 128)      f32   lane0 = per-row NCE sum, lane1 = sum(raw^2)
        j = pl.program_id(1)

        @pl.when(j == 0)
        def _init():
            m_ref[...] = jnp.full(m_ref.shape, -jnp.inf, jnp.float32)
            s_ref[...] = jnp.zeros(s_ref.shape, jnp.float32)
            sq_ref[...] = jnp.zeros(sq_ref.shape, jnp.float32)
            pos_ref[...] = jnp.zeros(pos_ref.shape, jnp.float32)

        # one fused lane-dense MXU matmul per grid step
        raw = jnp.dot(src_ref[...], trg_ref[...],
                      preferred_element_type=jnp.float32) * inv_sqrt_r   # (M, T)
        sq_ref[...] += jnp.sum(raw * raw, axis=1, keepdims=True)         # pre-clip
        clip = tclip * jnp.tanh(raw * inv_tclip)

        tb = tb_ref[...]                       # (1, T)
        is_pos = tb == rowb_ref[...]           # (M, T)  matched batch element
        excl = is_pos | (tb < 0)               # positives + pad columns

        # single online (flash-style) max / sum-exp update over the whole tile
        neg = jnp.where(excl, -tclip, clip)    # torch: positives pushed to -tclip
        m_prev = m_ref[...]
        m_new = jnp.maximum(m_prev, jnp.max(neg, axis=1, keepdims=True))
        ex = jnp.where(excl, 0.0, jnp.exp(neg - m_new))
        s_ref[...] = jnp.exp(m_prev - m_new) * s_ref[...] + \
            jnp.sum(ex, axis=1, keepdims=True)
        m_ref[...] = m_new

        # gather this tile's positive scores into their location slots with a
        # one-hot selection matmul (exact in f32; no unaligned lane slicing).
        clip_pos = jnp.where(is_pos, clip, 0.0)
        pos_ref[...] += jnp.dot(clip_pos, sel_ref[...],
                                preferred_element_type=jnp.float32)      # (M, LP)

        @pl.when(j == pl.num_programs(1) - 1)
        def _finalize():
            ps = pos_ref[...] - m_ref[...]                               # (M, LP)
            nce = ps - jnp.log(jnp.exp(ps) + s_ref[...])
            lanep = lax.broadcasted_iota(jnp.int32, (ps.shape[0], LP), 1)
            nce_rows = jnp.sum(jnp.where(lanep < L, nce, 0.0),
                               axis=1, keepdims=True)                    # (M, 1)
            laneo = lax.broadcasted_iota(jnp.int32, out_ref.shape, 1)
            out_ref[...] = jnp.where(laneo == 0, nce_rows,
                                     jnp.where(laneo == 1, sq_ref[...], 0.0))

    return kernel


def _nce_pair_fused(src_pair, trg_pair_nat, n_batch, B_pad, tclip):
    """Fused NCE stats for a symmetric pair of calls.

    src_pair     : (2, M, R) bf16 — M = G*B_pad rows (group g = rows g*B_pad..)
    trg_pair_nat : (2, nb, R, L) f32 — natural (free-reshape) target layout.
    Returns (out, L) with out (2, M, 128) f32: lane0 = per-row NCE sum,
    lane1 = per-row sum(raw^2).
    """
    P, M, R = src_pair.shape
    _, nb, _, L = trg_pair_nat.shape
    assert nb == n_batch
    N = nb * L
    LP = _round_up(L, 128)
    TILE_N = _pick_tile_n(N, R)
    N_pad = _round_up(N, TILE_N)
    n_steps = N_pad // TILE_N

    # lane-dense (R, nb*L) targets — the torch permute+reshape, done once in XLA;
    # the kernel then streams each target tensor exactly once.
    trg_t = jnp.transpose(trg_pair_nat, (0, 2, 1, 3)).reshape(P, R, N)
    trg_t = jnp.pad(trg_t, ((0, 0), (0, 0), (0, N_pad - N))).astype(jnp.bfloat16)

    # tiny per-column / per-row metadata (avoids int div/mod inside the kernel)
    cols = jnp.arange(N_pad, dtype=jnp.int32)
    valid = cols < N
    col_tb = jnp.where(valid, cols // L, -1).reshape(1, N_pad)            # (1, N_pad)
    sel = (jnp.where(valid, cols % L, -1)[:, None]
           == jnp.arange(LP, dtype=jnp.int32)[None, :]).astype(jnp.float32)
    row_b = (jnp.arange(M, dtype=jnp.int32) % B_pad).reshape(M, 1)

    kernel = _make_nce_kernel(tclip, R, L, LP)

    vmem_need = (2 * R * TILE_N * 2          # trg block (double-buffered)
                 + 2 * TILE_N * LP * 4       # sel block
                 + 2 * 8 * TILE_N * 4        # col_tb block
                 + 2 * M * R * 2             # src block
                 + 4 * M * 128 * 4           # row_b + out blocks (lane padded)
                 + M * (LP + 3 * 128) * 4)   # scratch
    vmem_limit = int(min(max(2 * vmem_need + (8 << 20), 32 << 20), 56 << 20))

    out = pl.pallas_call(
        kernel,
        out_shape=jax.ShapeDtypeStruct((P, M, 128), jnp.float32),
        grid_spec=pltpu.PrefetchScalarGridSpec(
            num_scalar_prefetch=0,
            grid=(P, n_steps),                      # j (columns) innermost!
            in_specs=[
                pl.BlockSpec((None, M, R), lambda p, j: (p, 0, 0)),
                pl.BlockSpec((None, R, TILE_N), lambda p, j: (p, 0, j)),
                pl.BlockSpec((1, TILE_N), lambda p, j: (0, j)),
                pl.BlockSpec((TILE_N, LP), lambda p, j: (j, 0)),
                pl.BlockSpec((M, 1), lambda p, j: (0, 0)),
            ],
            out_specs=pl.BlockSpec((None, M, 128), lambda p, j: (p, 0, 0)),
            scratch_shapes=[pltpu.VMEM((M, 1), jnp.float32),    # running neg max
                            pltpu.VMEM((M, 1), jnp.float32),    # running neg sumexp
                            pltpu.VMEM((M, 1), jnp.float32),    # sum(raw^2)
                            pltpu.VMEM((M, LP), jnp.float32)]), # positive scores
        compiler_params=pltpu.CompilerParams(
            dimension_semantics=("parallel", "arbitrary"),
            vmem_limit_bytes=vmem_limit),
        cost_estimate=pl.CostEstimate(
            flops=int(2 * P * M * N_pad * (R + LP)),
            transcendentals=int(2 * P * M * N_pad + 2 * P * M * LP),
            bytes_accessed=int(src_pair.size * 2 + trg_t.size * 2
                               + P * (sel.size * 4 + col_tb.size * 4 + row_b.size * 4)
                               + P * M * 128 * 4)),
    )(src_pair, trg_t, col_tb, sel, row_b)
    return out, L


def _sample_src_ftr(r_cnv, key):
    """Pick one random spatial location per batch element (masks_r5 equivalent)."""
    B, C, H, W = r_cnv.shape
    idx = jax.random.randint(key, (B,), 0, H * W)
    i, j = idx // W, idx % W
    return r_cnv[jnp.arange(B), :, i, j]                                  # (B, C)


def loss_multi_nce_forward(r1_x1, r5_x1, r7_x1, r1_x2, r5_x2, r7_x2, key, tclip=10.0):
    """JAX/Pallas equivalent of LossMultiNCE.forward (single-device path)."""
    B, R = r1_x1.shape[0], r1_x1.shape[1]
    B_pad = _round_up(B, 16)

    k1, k2 = jax.random.split(key)
    r1s1 = r1_x1.reshape(B, R)
    r1s2 = r1_x2.reshape(B, R)
    r5s1 = _sample_src_ftr(r5_x1, k1)
    r5s2 = _sample_src_ftr(r5_x2, k2)

    def pad_rows(x):
        return jnp.pad(x, ((0, B_pad - B), (0, 0))).astype(jnp.bfloat16)

    # groups sharing a target are merged into the matmul M dimension; the two
    # symmetric directions are fused along a size-2 parallel pair axis.
    src_ab = jnp.stack(
        [jnp.concatenate([pad_rows(r1s1), pad_rows(r5s1)], axis=0),
         jnp.concatenate([pad_rows(r1s2), pad_rows(r5s2)], axis=0)], axis=0)
    src_cd = jnp.stack([pad_rows(r1s1), pad_rows(r1s2)], axis=0)

    def nat(x):  # (B, R, H, W) -> (B, R, L), free reshape
        b, r, h, w = x.shape
        return x.reshape(b, r, h * w)

    trg_ab = jnp.stack([nat(r5_x2), nat(r5_x1)], axis=0)   # p=0: x1->x2, p=1: x2->x1
    trg_cd = jnp.stack([nat(r7_x2), nat(r7_x1)], axis=0)

    out_ab, L5 = _nce_pair_fused(src_ab, trg_ab, B, B_pad, tclip)  # groups: [1t5, 5t5]
    out_cd, L7 = _nce_pair_fused(src_cd, trg_cd, B, B_pad, tclip)  # groups: [1t7]

    def reduce_group(out, g, L):
        rows = slice(g * B_pad, g * B_pad + B)
        nce = jnp.sum(out[:, rows, 0], axis=1)                     # (2,)
        sq = jnp.sum(out[:, rows, 1], axis=1)
        return -nce / float(B * L), 0.05 * sq / float(B * B * L)

    l1t5, g1t5 = reduce_group(out_ab, 0, L5)
    l5t5, g5t5 = reduce_group(out_ab, 1, L5)
    l1t7, g1t7 = reduce_group(out_cd, 0, L7)

    loss_1t5 = 0.5 * jnp.sum(l1t5)
    loss_1t7 = 0.5 * jnp.sum(l1t7)
    loss_5t5 = 0.5 * jnp.sum(l5t5)
    lgt_reg = 0.5 * (jnp.sum(g1t5) + jnp.sum(g5t5) + jnp.sum(g1t7))
    return loss_1t5, loss_1t7, loss_5t5, lgt_reg


# ---------------- pure-JAX reference (mirrors the PyTorch math, f32) ----------------
def _loss_g2l_ref(r_src, r_trg, mask_mat, tclip=10.0):
    B, nb = mask_mat.shape
    L = r_trg.shape[1] // nb
    R = r_src.shape[1]
    mask_pos = jnp.broadcast_to(mask_mat[:, :, None], (B, nb, L)).astype(jnp.float32)
    mask_neg = 1.0 - mask_pos
    raw = (r_src @ r_trg).astype(jnp.float32).reshape(B, nb, L) / (R ** 0.5)
    lgt = 0.05 * jnp.mean(raw ** 2)
    raw = tclip * jnp.tanh(raw / tclip)
    pos = (mask_pos * raw).sum(axis=1)
    neg = (mask_neg * raw - tclip * mask_pos).reshape(B, -1)
    mn = mask_neg.reshape(B, -1)
    nmax = neg.max(axis=1, keepdims=True)
    nse = (mn * jnp.exp(neg - nmax)).sum(axis=1, keepdims=True)
    lse = jnp.log(jnp.exp(pos - nmax) + nse)
    nce = (pos - nmax) - lse
    return -jnp.mean(nce), lgt


def _forward_ref(r1_x1, r5_x1, r7_x1, r1_x2, r5_x2, r7_x2, key, tclip=10.0):
    B, R = r1_x1.shape[0], r1_x1.shape[1]
    mask_mat = jnp.eye(B, dtype=jnp.float32)
    k1, k2 = jax.random.split(key)
    r1s1, r1s2 = r1_x1.reshape(B, R), r1_x2.reshape(B, R)
    r5s1, r5s2 = _sample_src_ftr(r5_x1, k1), _sample_src_ftr(r5_x2, k2)
    trg = lambda x: jnp.transpose(x, (1, 0, 2, 3)).reshape(R, -1)
    pairs = [(r1s1, trg(r5_x2)), (r1s2, trg(r5_x1)),
             (r1s1, trg(r7_x2)), (r1s2, trg(r7_x1)),
             (r5s1, trg(r5_x2)), (r5s2, trg(r5_x1))]
    ls, gs = zip(*[_loss_g2l_ref(s, t, mask_mat, tclip) for s, t in pairs])
    return (0.5 * (ls[0] + ls[1]), 0.5 * (ls[2] + ls[3]),
            0.5 * (ls[4] + ls[5]), 0.5 * sum(gs))


if __name__ == "__main__":
    key = jax.random.PRNGKey(0)
    ks = jax.random.split(key, 7)
    B, R = 2, 32  # small shapes consistent with the module's conventions
    r1_x1 = jax.random.normal(ks[0], (B, R, 1, 1), jnp.float32)
    r5_x1 = jax.random.normal(ks[1], (B, R, 5, 5), jnp.float32)
    r7_x1 = jax.random.normal(ks[2], (B, R, 7, 7), jnp.float32)
    r1_x2 = jax.random.normal(ks[3], (B, R, 1, 1), jnp.float32)
    r5_x2 = jax.random.normal(ks[4], (B, R, 5, 5), jnp.float32)
    r7_x2 = jax.random.normal(ks[5], (B, R, 7, 7), jnp.float32)

    fwd = jax.jit(loss_multi_nce_forward)
    out = fwd(r1_x1, r5_x1, r7_x1, r1_x2, r5_x2, r7_x2, ks[6])
    out = jax.block_until_ready(out)

    ref = _forward_ref(r1_x1, r5_x1, r7_x1, r1_x2, r5_x2, r7_x2,
                       key=ks[6], tclip=10.0)
    # bf16 MXU operands (f32 accumulation) vs. the f32 reference: 2e-2 tolerance.
    for o, r in zip(out, ref):
        assert jnp.allclose(o, r, rtol=2e-2, atol=2e-2), (o, r)

    print("KERNEL_OK")
</pallas_src>

<mosaic_0001>
module attributes {stable_mosaic.version = 11 : i64} {
  func.func @kernel(%arg0: i32, %arg1: i32, %arg2: memref<1x32x32xbf16, #tpu.memory_space<vmem>>, %arg3: memref<1x32x128xbf16, #tpu.memory_space<vmem>>, %arg4: memref<1x128xi32, #tpu.memory_space<vmem>>, %arg5: memref<128x128xf32, #tpu.memory_space<vmem>>, %arg6: memref<32x1xi32, #tpu.memory_space<vmem>>, %arg7: memref<1x32x128xf32, #tpu.memory_space<vmem>>, %arg8: memref<32x1xf32, #tpu.memory_space<vmem>>, %arg9: memref<32x1xf32, #tpu.memory_space<vmem>>, %arg10: memref<32x1xf32, #tpu.memory_space<vmem>>, %arg11: memref<32x128xf32, #tpu.memory_space<vmem>>) attributes {dimension_semantics = [#tpu.dimension_semantics<parallel>, #tpu.dimension_semantics<arbitrary>], iteration_bounds = array<i64: 2, 1>, scalar_prefetch = 0 : i64, scratch_operands = 4 : i64, tpu.core_type = #tpu.core_type<tc>, window_params = [{transform_indices = @transform_0, window_bounds = array<i64: 1, 32, 32>}, {transform_indices = @transform_1, window_bounds = array<i64: 1, 32, 128>}, {transform_indices = @transform_2, window_bounds = array<i64: 1, 128>}, {transform_indices = @transform_3, window_bounds = array<i64: 128, 128>}, {pipeline_mode = #tpu.pipeline_mode<synchronous>, transform_indices = @transform_4, window_bounds = array<i64: 32, 1>}, {transform_indices = @transform_5, window_bounds = array<i64: 1, 32, 128>}]} {
    %c0_i32 = arith.constant 0 : i32
    %0 = arith.cmpi eq, %arg1, %c0_i32 : i32
    %1 = arith.extui %0 : i1 to i32
    %c0_i32_0 = arith.constant 0 : i32
    %2 = arith.cmpi ne, %1, %c0_i32_0 : i32
    scf.if %2 {
      %cst_41 = arith.constant 0xFF800000 : f32
      %60 = vector.broadcast %cst_41 : f32 to vector<32x1xf32>
      %c0_42 = arith.constant 0 : index
      %c0_43 = arith.constant 0 : index
      %61 = vector.load %arg8[%c0_42, %c0_43] : memref<32x1xf32, #tpu.memory_space<vmem>>, vector<32x1xf32>
      tpu.vector_store %arg8[%c0_42, %c0_43], %60 {strides = array<i32>} : memref<32x1xf32, #tpu.memory_space<vmem>>, vector<32x1xf32>,
      %cst_44 = arith.constant 0.000000e+00 : f32
      %62 = vector.broadcast %cst_44 : f32 to vector<32x1xf32>
      %c0_45 = arith.constant 0 : index
      %c0_46 = arith.constant 0 : index
      %63 = vector.load %arg9[%c0_45, %c0_46] : memref<32x1xf32, #tpu.memory_space<vmem>>, vector<32x1xf32>
      tpu.vector_store %arg9[%c0_45, %c0_46], %62 {strides = array<i32>} : memref<32x1xf32, #tpu.memory_space<vmem>>, vector<32x1xf32>,
      %cst_47 = arith.constant 0.000000e+00 : f32
      %64 = vector.broadcast %cst_47 : f32 to vector<32x1xf32>
      %c0_48 = arith.constant 0 : index
      %c0_49 = arith.constant 0 : index
      %65 = vector.load %arg10[%c0_48, %c0_49] : memref<32x1xf32, #tpu.memory_space<vmem>>, vector<32x1xf32>
      tpu.vector_store %arg10[%c0_48, %c0_49], %64 {strides = array<i32>} : memref<32x1xf32, #tpu.memory_space<vmem>>, vector<32x1xf32>,
      %cst_50 = arith.constant 0.000000e+00 : f32
      %66 = vector.broadcast %cst_50 : f32 to vector<32x128xf32>
      %c0_51 = arith.constant 0 : index
      %c0_52 = arith.constant 0 : index
      %67 = vector.load %arg11[%c0_51, %c0_52] : memref<32x128xf32, #tpu.memory_space<vmem>>, vector<32x128xf32>
      tpu.vector_store %arg11[%c0_51, %c0_52], %66 {strides = array<i32>} : memref<32x128xf32, #tpu.memory_space<vmem>>, vector<32x128xf32>,
    } else {
    }
    %c0 = arith.constant 0 : index
    %c0_1 = arith.constant 0 : index
    %c0_2 = arith.constant 0 : index
    %3 = vector.load %arg2[%c0, %c0_1, %c0_2] : memref<1x32x32xbf16, #tpu.memory_space<vmem>>, vector<1x32x32xbf16>
    %4 = vector.shape_cast %3 : vector<1x32x32xbf16> to vector<32x32xbf16>
    %c0_3 = arith.constant 0 : index
    %c0_4 = arith.constant 0 : index
    %c0_5 = arith.constant 0 : index
    %5 = vector.load %arg3[%c0_3, %c0_4, %c0_5] : memref<1x32x128xbf16, #tpu.memory_space<vmem>>, vector<1x32x128xbf16>
    %6 = vector.shape_cast %5 : vector<1x32x128xbf16> to vector<32x128xbf16>
    %cst = arith.constant dense<0.000000e+00> : vector<32x128xf32>
    %7 = tpu.matmul %4, %6, %cst {dimension_numbers = #tpu.dot_dimension_numbers<[1], [0], [0], [1], [0, 0, 1, 1], [], []>} : vector<32x32xbf16>, vector<32x128xbf16>, vector<32x128xf32> -> vector<32x128xf32>
    %cst_6 = arith.constant 0.176776692 : f32
    %8 = vector.broadcast %cst_6 : f32 to vector<32x128xf32>
    %9 = arith.mulf %7, %8 : vector<32x128xf32>
    %c0_7 = arith.constant 0 : index
    %c0_8 = arith.constant 0 : index
    %10 = vector.load %arg10[%c0_7, %c0_8] : memref<32x1xf32, #tpu.memory_space<vmem>>, vector<32x1xf32>
    %11 = arith.mulf %9, %9 : vector<32x128xf32>
    %cst_9 = arith.constant dense<0.000000e+00> : vector<32xf32>
    %12 = vector.multi_reduction <add>, %11, %cst_9 [1] : vector<32x128xf32> to vector<32xf32>
    %13 = vector.shape_cast %12 : vector<32xf32> to vector<32x1xf32>
    %14 = arith.addf %10, %13 : vector<32x1xf32>
    %c0_10 = arith.constant 0 : index
    %c0_11 = arith.constant 0 : index
    %15 = vector.load %arg10[%c0_10, %c0_11] : memref<32x1xf32, #tpu.memory_space<vmem>>, vector<32x1xf32>
    tpu.vector_store %arg10[%c0_10, %c0_11], %14 {strides = array<i32>} : memref<32x1xf32, #tpu.memory_space<vmem>>, vector<32x1xf32>,
    %cst_12 = arith.constant 1.000000e-01 : f32
    %16 = vector.broadcast %cst_12 : f32 to vector<32x128xf32>
    %17 = arith.mulf %9, %16 : vector<32x128xf32>
    %18 = math.tanh %17 : vector<32x128xf32>
    %cst_13 = arith.constant 1.000000e+01 : f32
    %19 = vector.broadcast %cst_13 : f32 to vector<32x128xf32>
    %20 = arith.mulf %19, %18 : vector<32x128xf32>
    %c0_14 = arith.constant 0 : index
    %c0_15 = arith.constant 0 : index
    %21 = vector.load %arg4[%c0_14, %c0_15] : memref<1x128xi32, #tpu.memory_space<vmem>>, vector<1x128xi32>
    %c0_16 = arith.constant 0 : index
    %c0_17 = arith.constant 0 : index
    %22 = vector.load %arg6[%c0_16, %c0_17] : memref<32x1xi32, #tpu.memory_space<vmem>>, vector<32x1xi32>
    %23 = vector.broadcast %21 : vector<1x128xi32> to vector<32x128xi32>
    %24 = vector.broadcast %22 : vector<32x1xi32> to vector<32x128xi32>
    %25 = arith.cmpi eq, %23, %24 : vector<32x128xi32>
    %c0_i32_18 = arith.constant 0 : i32
    %26 = vector.broadcast %c0_i32_18 : i32 to vector<1x128xi32>
    %27 = arith.cmpi slt, %21, %26 : vector<1x128xi32>
    %28 = vector.broadcast %27 : vector<1x128xi1> to vector<32x128xi1>
    %29 = arith.ori %25, %28 : vector<32x128xi1>
    %cst_19 = arith.constant -1.000000e+01 : f32
    %30 = vector.broadcast %cst_19 : f32 to vector<32x128xf32>
    %31 = arith.select %29, %30, %20 : vector<32x128xi1>, vector<32x128xf32>
    %c0_20 = arith.constant 0 : index
    %c0_21 = arith.constant 0 : index
    %32 = vector.load %arg8[%c0_20, %c0_21] : memref<32x1xf32, #tpu.memory_space<vmem>>, vector<32x1xf32>
    %cst_22 = arith.constant dense<0xFF800000> : vector<32xf32>
    %33 = vector.multi_reduction <maximumf>, %31, %cst_22 [1] : vector<32x128xf32> to vector<32xf32>
    %34 = vector.shape_cast %33 : vector<32xf32> to vector<32x1xf32>
    %35 = arith.maximumf %32, %34 : vector<32x1xf32>
    %36 = vector.broadcast %35 : vector<32x1xf32> to vector<32x128xf32>
    %37 = arith.subf %31, %36 : vector<32x128xf32>
    %38 = math.exp %37 : vector<32x128xf32>
    %cst_23 = arith.constant 0.000000e+00 : f32
    %39 = vector.broadcast %cst_23 : f32 to vector<32x128xf32>
    %40 = arith.select %29, %39, %38 : vector<32x128xi1>, vector<32x128xf32>
    %41 = arith.subf %32, %35 : vector<32x1xf32>
    %42 = math.exp %41 : vector<32x1xf32>
    %c0_24 = arith.constant 0 : index
    %c0_25 = arith.constant 0 : index
    %43 = vector.load %arg9[%c0_24, %c0_25] : memref<32x1xf32, #tpu.memory_space<vmem>>, vector<32x1xf32>
    %44 = arith.mulf %42, %43 : vector<32x1xf32>
    %cst_26 = arith.constant dense<0.000000e+00> : vector<32xf32>
    %45 = vector.multi_reduction <add>, %40, %cst_26 [1] : vector<32x128xf32> to vector<32xf32>
    %46 = vector.shape_cast %45 : vector<32xf32> to vector<32x1xf32>
    %47 = arith.addf %44, %46 : vector<32x1xf32>
    %c0_27 = arith.constant 0 : index
    %c0_28 = arith.constant 0 : index
    %48 = vector.load %arg9[%c0_27, %c0_28] : memref<32x1xf32, #tpu.memory_space<vmem>>, vector<32x1xf32>
    tpu.vector_store %arg9[%c0_27, %c0_28], %47 {strides = array<i32>} : memref<32x1xf32, #tpu.memory_space<vmem>>, vector<32x1xf32>,
    %c0_29 = arith.constant 0 : index
    %c0_30 = arith.constant 0 : index
    %49 = vector.load %arg8[%c0_29, %c0_30] : memref<32x1xf32, #tpu.memory_space<vmem>>, vector<32x1xf32>
    tpu.vector_store %arg8[%c0_29, %c0_30], %35 {strides = array<i32>} : memref<32x1xf32, #tpu.memory_space<vmem>>, vector<32x1xf32>,
    %cst_31 = arith.constant 0.000000e+00 : f32
    %50 = vector.broadcast %cst_31 : f32 to vector<32x128xf32>
    %51 = arith.select %25, %20, %50 : vector<32x128xi1>, vector<32x128xf32>
    %c0_32 = arith.constant 0 : index
    %c0_33 = arith.constant 0 : index
    %52 = vector.load %arg11[%c0_32, %c0_33] : memref<32x128xf32, #tpu.memory_space<vmem>>, vector<32x128xf32>
    %c0_34 = arith.constant 0 : index
    %c0_35 = arith.constant 0 : index
    %53 = vector.load %arg5[%c0_34, %c0_35] : memref<128x128xf32, #tpu.memory_space<vmem>>, vector<128x128xf32>
    %cst_36 = arith.constant dense<0.000000e+00> : vector<32x128xf32>
    %54 = tpu.matmul %51, %53, %cst_36 {dimension_numbers = #tpu.dot_dimension_numbers<[1], [0], [0], [1], [0, 0, 1, 1], [], []>} : vector<32x128xf32>, vector<128x128xf32>, vector<32x128xf32> -> vector<32x128xf32>
    %55 = arith.addf %52, %54 : vector<32x128xf32>
    %c0_37 = arith.constant 0 : index
    %c0_38 = arith.constant 0 : index
    %56 = vector.load %arg11[%c0_37, %c0_38] : memref<32x128xf32, #tpu.memory_space<vmem>>, vector<32x128xf32>
    tpu.vector_store %arg11[%c0_37, %c0_38], %55 {strides = array<i32>} : memref<32x128xf32, #tpu.memory_space<vmem>>, vector<32x128xf32>,
    %c0_i32_39 = arith.constant 0 : i32
    %57 = arith.cmpi eq, %arg1, %c0_i32_39 : i32
    %58 = arith.extui %57 : i1 to i32
    %c0_i32_40 = arith.constant 0 : i32
    %59 = arith.cmpi ne, %58, %c0_i32_40 : i32
    scf.if %59 {
      %c0_41 = arith.constant 0 : index
      %c0_42 = arith.constant 0 : index
      %60 = vector.load %arg11[%c0_41, %c0_42] : memref<32x128xf32, #tpu.memory_space<vmem>>, vector<32x128xf32>
      %c0_43 = arith.constant 0 : index
      %c0_44 = arith.constant 0 : index
      %61 = vector.load %arg8[%c0_43, %c0_44] : memref<32x1xf32, #tpu.memory_space<vmem>>, vector<32x1xf32>
      %62 = vector.broadcast %61 : vector<32x1xf32> to vector<32x128xf32>
      %63 = arith.subf %60, %62 : vector<32x128xf32>
      %64 = math.exp %63 : vector<32x128xf32>
      %c0_45 = arith.constant 0 : index
      %c0_46 = arith.constant 0 : index
      %65 = vector.load %arg9[%c0_45, %c0_46] : memref<32x1xf32, #tpu.memory_space<vmem>>, vector<32x1xf32>
      %66 = vector.broadcast %65 : vector<32x1xf32> to vector<32x128xf32>
      %67 = arith.addf %64, %66 : vector<32x128xf32>
      %68 = math.log %67 : vector<32x128xf32>
      %69 = arith.subf %63, %68 : vector<32x128xf32>
      %70 = tpu.iota {dimensions = array<i32: 1>} : vector<32x128xi32>
      %c25_i32 = arith.constant 25 : i32
      %71 = vector.broadcast %c25_i32 : i32 to vector<32x128xi32>
      %72 = arith.cmpi slt, %70, %71 : vector<32x128xi32>
      %cst_47 = arith.constant 0.000000e+00 : f32
      %73 = vector.broadcast %cst_47 : f32 to vector<32x128xf32>
      %74 = arith.select %72, %69, %73 : vector<32x128xi1>, vector<32x128xf32>
      %cst_48 = arith.constant dense<0.000000e+00> : vector<32xf32>
      %75 = vector.multi_reduction <add>, %74, %cst_48 [1] : vector<32x128xf32> to vector<32xf32>
      %76 = vector.shape_cast %75 : vector<32xf32> to vector<32x1xf32>
      %77 = tpu.iota {dimensions = array<i32: 1>} : vector<32x128xi32>
      %c0_i32_49 = arith.constant 0 : i32
      %78 = vector.broadcast %c0_i32_49 : i32 to vector<32x128xi32>
      %79 = arith.cmpi eq, %77, %78 : vector<32x128xi32>
      %c1_i32 = arith.constant 1 : i32
      %80 = vector.broadcast %c1_i32 : i32 to vector<32x128xi32>
      %81 = arith.cmpi eq, %77, %80 : vector<32x128xi32>
      %c0_50 = arith.constant 0 : index
      %c0_51 = arith.constant 0 : index
      %82 = vector.load %arg10[%c0_50, %c0_51] : memref<32x1xf32, #tpu.memory_space<vmem>>, vector<32x1xf32>
      %cst_52 = arith.constant 0.000000e+00 : f32
      %83 = vector.shape_cast %82 : vector<32x1xf32> to vector<32x1xf32>
      %84 = vector.broadcast %83 : vector<32x1xf32> to vector<32x128xf32>
      %85 = vector.broadcast %cst_52 : f32 to vector<32x128xf32>
      %86 = arith.select %81, %84, %85 : vector<32x128xi1>, vector<32x128xf32>
      %87 = vector.shape_cast %76 : vector<32x1xf32> to vector<32x1xf32>
      %88 = vector.broadcast %87 : vector<32x1xf32> to vector<32x128xf32>
      %89 = arith.select %79, %88, %86 : vector<32x128xi1>, vector<32x128xf32>
      %c0_53 = arith.constant 0 : index
      %c0_54 = arith.constant 0 : index
      %c0_55 = arith.constant 0 : index
      %90 = vector.load %arg7[%c0_53, %c0_54, %c0_55] : memref<1x32x128xf32, #tpu.memory_space<vmem>>, vector<1x32x128xf32>
      %91 = vector.shape_cast %90 : vector<1x32x128xf32> to vector<32x128xf32>
      %92 = vector.shape_cast %89 : vector<32x128xf32> to vector<1x32x128xf32>
      tpu.vector_store %arg7[%c0_53, %c0_54, %c0_55], %92 {strides = array<i32>} : memref<1x32x128xf32, #tpu.memory_space<vmem>>, vector<1x32x128xf32>,
    } else {
    }
    return
  }
  func.func @transform_0(%arg0: i32, %arg1: i32) -> (i32, i32, i32) {
    %c0_i32 = arith.constant 0 : i32
    %c0_i32_0 = arith.constant 0 : i32
    %c0_i32_1 = arith.constant 0 : i32
    return %arg0, %c0_i32, %c0_i32_0 : i32, i32, i32
  }
  func.func @transform_1(%arg0: i32, %arg1: i32) -> (i32, i32, i32) {
    %c0_i32 = arith.constant 0 : i32
    %c0_i32_0 = arith.constant 0 : i32
    return %arg0, %c0_i32, %arg1 : i32, i32, i32
  }
  func.func @transform_2(%arg0: i32, %arg1: i32) -> (i32, i32) {
    %c0_i32 = arith.constant 0 : i32
    %c0_i32_0 = arith.constant 0 : i32
    return %c0_i32, %arg1 : i32, i32
  }
  func.func @transform_3(%arg0: i32, %arg1: i32) -> (i32, i32) {
    %c0_i32 = arith.constant 0 : i32
    %c0_i32_0 = arith.constant 0 : i32
    return %arg1, %c0_i32 : i32, i32
  }
  func.func @transform_4(%arg0: i32, %arg1: i32) -> (i32, i32) {
    %c0_i32 = arith.constant 0 : i32
    %c0_i32_0 = arith.constant 0 : i32
    %c0_i32_1 = arith.constant 0 : i32
    return %c0_i32, %c0_i32_0 : i32, i32
  }
  func.func @transform_5(%arg0: i32, %arg1: i32) -> (i32, i32, i32) {
    %c0_i32 = arith.constant 0 : i32
    %c0_i32_0 = arith.constant 0 : i32
    %c0_i32_1 = arith.constant 0 : i32
    return %arg0, %c0_i32, %c0_i32_0 : i32, i32, i32
  }
}

module attributes {stable_mosaic.version = 11 : i64} {
  func.func @kernel(%arg0: i32, %arg1: i32, %arg2: memref<1x16x32xbf16, #tpu.memory_space<vmem>>, %arg3: memref<1x32x128xbf16, #tpu.memory_space<vmem>>, %arg4: memref<1x128xi32, #tpu.memory_space<vmem>>, %arg5: memref<128x128xf32, #tpu.memory_space<vmem>>, %arg6: memref<16x1xi32, #tpu.memory_space<vmem>>, %arg7: memref<1x16x128xf32, #tpu.memory_space<vmem>>, %arg8: memref<16x1xf32, #tpu.memory_space<vmem>>, %arg9: memref<16x1xf32, #tpu.memory_space<vmem>>, %arg10: memref<16x1xf32, #tpu.memory_space<vmem>>, %arg11: memref<16x128xf32, #tpu.memory_space<vmem>>) attributes {dimension_semantics = [#tpu.dimension_semantics<parallel>, #tpu.dimension_semantics<arbitrary>], iteration_bounds = array<i64: 2, 1>, scalar_prefetch = 0 : i64, scratch_operands = 4 : i64, tpu.core_type = #tpu.core_type<tc>, window_params = [{transform_indices = @transform_0, window_bounds = array<i64: 1, 16, 32>}, {transform_indices = @transform_1, window_bounds = array<i64: 1, 32, 128>}, {transform_indices = @transform_2, window_bounds = array<i64: 1, 128>}, {transform_indices = @transform_3, window_bounds = array<i64: 128, 128>}, {pipeline_mode = #tpu.pipeline_mode<synchronous>, transform_indices = @transform_4, window_bounds = array<i64: 16, 1>}, {transform_indices = @transform_5, window_bounds = array<i64: 1, 16, 128>}]} {
    %c0_i32 = arith.constant 0 : i32
    %0 = arith.cmpi eq, %arg1, %c0_i32 : i32
    %1 = arith.extui %0 : i1 to i32
    %c0_i32_0 = arith.constant 0 : i32
    %2 = arith.cmpi ne, %1, %c0_i32_0 : i32
    scf.if %2 {
      %cst_41 = arith.constant 0xFF800000 : f32
      %60 = vector.broadcast %cst_41 : f32 to vector<16x1xf32>
      %c0_42 = arith.constant 0 : index
      %c0_43 = arith.constant 0 : index
      %61 = vector.load %arg8[%c0_42, %c0_43] : memref<16x1xf32, #tpu.memory_space<vmem>>, vector<16x1xf32>
      tpu.vector_store %arg8[%c0_42, %c0_43], %60 {strides = array<i32>} : memref<16x1xf32, #tpu.memory_space<vmem>>, vector<16x1xf32>,
      %cst_44 = arith.constant 0.000000e+00 : f32
      %62 = vector.broadcast %cst_44 : f32 to vector<16x1xf32>
      %c0_45 = arith.constant 0 : index
      %c0_46 = arith.constant 0 : index
      %63 = vector.load %arg9[%c0_45, %c0_46] : memref<16x1xf32, #tpu.memory_space<vmem>>, vector<16x1xf32>
      tpu.vector_store %arg9[%c0_45, %c0_46], %62 {strides = array<i32>} : memref<16x1xf32, #tpu.memory_space<vmem>>, vector<16x1xf32>,
      %cst_47 = arith.constant 0.000000e+00 : f32
      %64 = vector.broadcast %cst_47 : f32 to vector<16x1xf32>
      %c0_48 = arith.constant 0 : index
      %c0_49 = arith.constant 0 : index
      %65 = vector.load %arg10[%c0_48, %c0_49] : memref<16x1xf32, #tpu.memory_space<vmem>>, vector<16x1xf32>
      tpu.vector_store %arg10[%c0_48, %c0_49], %64 {strides = array<i32>} : memref<16x1xf32, #tpu.memory_space<vmem>>, vector<16x1xf32>,
      %cst_50 = arith.constant 0.000000e+00 : f32
      %66 = vector.broadcast %cst_50 : f32 to vector<16x128xf32>
      %c0_51 = arith.constant 0 : index
      %c0_52 = arith.constant 0 : index
      %67 = vector.load %arg11[%c0_51, %c0_52] : memref<16x128xf32, #tpu.memory_space<vmem>>, vector<16x128xf32>
      tpu.vector_store %arg11[%c0_51, %c0_52], %66 {strides = array<i32>} : memref<16x128xf32, #tpu.memory_space<vmem>>, vector<16x128xf32>,
    } else {
    }
    %c0 = arith.constant 0 : index
    %c0_1 = arith.constant 0 : index
    %c0_2 = arith.constant 0 : index
    %3 = vector.load %arg2[%c0, %c0_1, %c0_2] : memref<1x16x32xbf16, #tpu.memory_space<vmem>>, vector<1x16x32xbf16>
    %4 = vector.shape_cast %3 : vector<1x16x32xbf16> to vector<16x32xbf16>
    %c0_3 = arith.constant 0 : index
    %c0_4 = arith.constant 0 : index
    %c0_5 = arith.constant 0 : index
    %5 = vector.load %arg3[%c0_3, %c0_4, %c0_5] : memref<1x32x128xbf16, #tpu.memory_space<vmem>>, vector<1x32x128xbf16>
    %6 = vector.shape_cast %5 : vector<1x32x128xbf16> to vector<32x128xbf16>
    %cst = arith.constant dense<0.000000e+00> : vector<16x128xf32>
    %7 = tpu.matmul %4, %6, %cst {dimension_numbers = #tpu.dot_dimension_numbers<[1], [0], [0], [1], [0, 0, 1, 1], [], []>} : vector<16x32xbf16>, vector<32x128xbf16>, vector<16x128xf32> -> vector<16x128xf32>
    %cst_6 = arith.constant 0.176776692 : f32
    %8 = vector.broadcast %cst_6 : f32 to vector<16x128xf32>
    %9 = arith.mulf %7, %8 : vector<16x128xf32>
    %c0_7 = arith.constant 0 : index
    %c0_8 = arith.constant 0 : index
    %10 = vector.load %arg10[%c0_7, %c0_8] : memref<16x1xf32, #tpu.memory_space<vmem>>, vector<16x1xf32>
    %11 = arith.mulf %9, %9 : vector<16x128xf32>
    %cst_9 = arith.constant dense<0.000000e+00> : vector<16xf32>
    %12 = vector.multi_reduction <add>, %11, %cst_9 [1] : vector<16x128xf32> to vector<16xf32>
    %13 = vector.shape_cast %12 : vector<16xf32> to vector<16x1xf32>
    %14 = arith.addf %10, %13 : vector<16x1xf32>
    %c0_10 = arith.constant 0 : index
    %c0_11 = arith.constant 0 : index
    %15 = vector.load %arg10[%c0_10, %c0_11] : memref<16x1xf32, #tpu.memory_space<vmem>>, vector<16x1xf32>
    tpu.vector_store %arg10[%c0_10, %c0_11], %14 {strides = array<i32>} : memref<16x1xf32, #tpu.memory_space<vmem>>, vector<16x1xf32>,
    %cst_12 = arith.constant 1.000000e-01 : f32
    %16 = vector.broadcast %cst_12 : f32 to vector<16x128xf32>
    %17 = arith.mulf %9, %16 : vector<16x128xf32>
    %18 = math.tanh %17 : vector<16x128xf32>
    %cst_13 = arith.constant 1.000000e+01 : f32
    %19 = vector.broadcast %cst_13 : f32 to vector<16x128xf32>
    %20 = arith.mulf %19, %18 : vector<16x128xf32>
    %c0_14 = arith.constant 0 : index
    %c0_15 = arith.constant 0 : index
    %21 = vector.load %arg4[%c0_14, %c0_15] : memref<1x128xi32, #tpu.memory_space<vmem>>, vector<1x128xi32>
    %c0_16 = arith.constant 0 : index
    %c0_17 = arith.constant 0 : index
    %22 = vector.load %arg6[%c0_16, %c0_17] : memref<16x1xi32, #tpu.memory_space<vmem>>, vector<16x1xi32>
    %23 = vector.broadcast %21 : vector<1x128xi32> to vector<16x128xi32>
    %24 = vector.broadcast %22 : vector<16x1xi32> to vector<16x128xi32>
    %25 = arith.cmpi eq, %23, %24 : vector<16x128xi32>
    %c0_i32_18 = arith.constant 0 : i32
    %26 = vector.broadcast %c0_i32_18 : i32 to vector<1x128xi32>
    %27 = arith.cmpi slt, %21, %26 : vector<1x128xi32>
    %28 = vector.broadcast %27 : vector<1x128xi1> to vector<16x128xi1>
    %29 = arith.ori %25, %28 : vector<16x128xi1>
    %cst_19 = arith.constant -1.000000e+01 : f32
    %30 = vector.broadcast %cst_19 : f32 to vector<16x128xf32>
    %31 = arith.select %29, %30, %20 : vector<16x128xi1>, vector<16x128xf32>
    %c0_20 = arith.constant 0 : index
    %c0_21 = arith.constant 0 : index
    %32 = vector.load %arg8[%c0_20, %c0_21] : memref<16x1xf32, #tpu.memory_space<vmem>>, vector<16x1xf32>
    %cst_22 = arith.constant dense<0xFF800000> : vector<16xf32>
    %33 = vector.multi_reduction <maximumf>, %31, %cst_22 [1] : vector<16x128xf32> to vector<16xf32>
    %34 = vector.shape_cast %33 : vector<16xf32> to vector<16x1xf32>
    %35 = arith.maximumf %32, %34 : vector<16x1xf32>
    %36 = vector.broadcast %35 : vector<16x1xf32> to vector<16x128xf32>
    %37 = arith.subf %31, %36 : vector<16x128xf32>
    %38 = math.exp %37 : vector<16x128xf32>
    %cst_23 = arith.constant 0.000000e+00 : f32
    %39 = vector.broadcast %cst_23 : f32 to vector<16x128xf32>
    %40 = arith.select %29, %39, %38 : vector<16x128xi1>, vector<16x128xf32>
    %41 = arith.subf %32, %35 : vector<16x1xf32>
    %42 = math.exp %41 : vector<16x1xf32>
    %c0_24 = arith.constant 0 : index
    %c0_25 = arith.constant 0 : index
    %43 = vector.load %arg9[%c0_24, %c0_25] : memref<16x1xf32, #tpu.memory_space<vmem>>, vector<16x1xf32>
    %44 = arith.mulf %42, %43 : vector<16x1xf32>
    %cst_26 = arith.constant dense<0.000000e+00> : vector<16xf32>
    %45 = vector.multi_reduction <add>, %40, %cst_26 [1] : vector<16x128xf32> to vector<16xf32>
    %46 = vector.shape_cast %45 : vector<16xf32> to vector<16x1xf32>
    %47 = arith.addf %44, %46 : vector<16x1xf32>
    %c0_27 = arith.constant 0 : index
    %c0_28 = arith.constant 0 : index
    %48 = vector.load %arg9[%c0_27, %c0_28] : memref<16x1xf32, #tpu.memory_space<vmem>>, vector<16x1xf32>
    tpu.vector_store %arg9[%c0_27, %c0_28], %47 {strides = array<i32>} : memref<16x1xf32, #tpu.memory_space<vmem>>, vector<16x1xf32>,
    %c0_29 = arith.constant 0 : index
    %c0_30 = arith.constant 0 : index
    %49 = vector.load %arg8[%c0_29, %c0_30] : memref<16x1xf32, #tpu.memory_space<vmem>>, vector<16x1xf32>
    tpu.vector_store %arg8[%c0_29, %c0_30], %35 {strides = array<i32>} : memref<16x1xf32, #tpu.memory_space<vmem>>, vector<16x1xf32>,
    %cst_31 = arith.constant 0.000000e+00 : f32
    %50 = vector.broadcast %cst_31 : f32 to vector<16x128xf32>
    %51 = arith.select %25, %20, %50 : vector<16x128xi1>, vector<16x128xf32>
    %c0_32 = arith.constant 0 : index
    %c0_33 = arith.constant 0 : index
    %52 = vector.load %arg11[%c0_32, %c0_33] : memref<16x128xf32, #tpu.memory_space<vmem>>, vector<16x128xf32>
    %c0_34 = arith.constant 0 : index
    %c0_35 = arith.constant 0 : index
    %53 = vector.load %arg5[%c0_34, %c0_35] : memref<128x128xf32, #tpu.memory_space<vmem>>, vector<128x128xf32>
    %cst_36 = arith.constant dense<0.000000e+00> : vector<16x128xf32>
    %54 = tpu.matmul %51, %53, %cst_36 {dimension_numbers = #tpu.dot_dimension_numbers<[1], [0], [0], [1], [0, 0, 1, 1], [], []>} : vector<16x128xf32>, vector<128x128xf32>, vector<16x128xf32> -> vector<16x128xf32>
    %55 = arith.addf %52, %54 : vector<16x128xf32>
    %c0_37 = arith.constant 0 : index
    %c0_38 = arith.constant 0 : index
    %56 = vector.load %arg11[%c0_37, %c0_38] : memref<16x128xf32, #tpu.memory_space<vmem>>, vector<16x128xf32>
    tpu.vector_store %arg11[%c0_37, %c0_38], %55 {strides = array<i32>} : memref<16x128xf32, #tpu.memory_space<vmem>>, vector<16x128xf32>,
    %c0_i32_39 = arith.constant 0 : i32
    %57 = arith.cmpi eq, %arg1, %c0_i32_39 : i32
    %58 = arith.extui %57 : i1 to i32
    %c0_i32_40 = arith.constant 0 : i32
    %59 = arith.cmpi ne, %58, %c0_i32_40 : i32
    scf.if %59 {
      %c0_41 = arith.constant 0 : index
      %c0_42 = arith.constant 0 : index
      %60 = vector.load %arg11[%c0_41, %c0_42] : memref<16x128xf32, #tpu.memory_space<vmem>>, vector<16x128xf32>
      %c0_43 = arith.constant 0 : index
      %c0_44 = arith.constant 0 : index
      %61 = vector.load %arg8[%c0_43, %c0_44] : memref<16x1xf32, #tpu.memory_space<vmem>>, vector<16x1xf32>
      %62 = vector.broadcast %61 : vector<16x1xf32> to vector<16x128xf32>
      %63 = arith.subf %60, %62 : vector<16x128xf32>
      %64 = math.exp %63 : vector<16x128xf32>
      %c0_45 = arith.constant 0 : index
      %c0_46 = arith.constant 0 : index
      %65 = vector.load %arg9[%c0_45, %c0_46] : memref<16x1xf32, #tpu.memory_space<vmem>>, vector<16x1xf32>
      %66 = vector.broadcast %65 : vector<16x1xf32> to vector<16x128xf32>
      %67 = arith.addf %64, %66 : vector<16x128xf32>
      %68 = math.log %67 : vector<16x128xf32>
      %69 = arith.subf %63, %68 : vector<16x128xf32>
      %70 = tpu.iota {dimensions = array<i32: 1>} : vector<16x128xi32>
      %c49_i32 = arith.constant 49 : i32
      %71 = vector.broadcast %c49_i32 : i32 to vector<16x128xi32>
      %72 = arith.cmpi slt, %70, %71 : vector<16x128xi32>
      %cst_47 = arith.constant 0.000000e+00 : f32
      %73 = vector.broadcast %cst_47 : f32 to vector<16x128xf32>
      %74 = arith.select %72, %69, %73 : vector<16x128xi1>, vector<16x128xf32>
      %cst_48 = arith.constant dense<0.000000e+00> : vector<16xf32>
      %75 = vector.multi_reduction <add>, %74, %cst_48 [1] : vector<16x128xf32> to vector<16xf32>
      %76 = vector.shape_cast %75 : vector<16xf32> to vector<16x1xf32>
      %77 = tpu.iota {dimensions = array<i32: 1>} : vector<16x128xi32>
      %c0_i32_49 = arith.constant 0 : i32
      %78 = vector.broadcast %c0_i32_49 : i32 to vector<16x128xi32>
      %79 = arith.cmpi eq, %77, %78 : vector<16x128xi32>
      %c1_i32 = arith.constant 1 : i32
      %80 = vector.broadcast %c1_i32 : i32 to vector<16x128xi32>
      %81 = arith.cmpi eq, %77, %80 : vector<16x128xi32>
      %c0_50 = arith.constant 0 : index
      %c0_51 = arith.constant 0 : index
      %82 = vector.load %arg10[%c0_50, %c0_51] : memref<16x1xf32, #tpu.memory_space<vmem>>, vector<16x1xf32>
      %cst_52 = arith.constant 0.000000e+00 : f32
      %83 = vector.shape_cast %82 : vector<16x1xf32> to vector<16x1xf32>
      %84 = vector.broadcast %83 : vector<16x1xf32> to vector<16x128xf32>
      %85 = vector.broadcast %cst_52 : f32 to vector<16x128xf32>
      %86 = arith.select %81, %84, %85 : vector<16x128xi1>, vector<16x128xf32>
      %87 = vector.shape_cast %76 : vector<16x1xf32> to vector<16x1xf32>
      %88 = vector.broadcast %87 : vector<16x1xf32> to vector<16x128xf32>
      %89 = arith.select %79, %88, %86 : vector<16x128xi1>, vector<16x128xf32>
      %c0_53 = arith.constant 0 : index
      %c0_54 = arith.constant 0 : index
      %c0_55 = arith.constant 0 : index
      %90 = vector.load %arg7[%c0_53, %c0_54, %c0_55] : memref<1x16x128xf32, #tpu.memory_space<vmem>>, vector<1x16x128xf32>
      %91 = vector.shape_cast %90 : vector<1x16x128xf32> to vector<16x128xf32>
      %92 = vector.shape_cast %89 : vector<16x128xf32> to vector<1x16x128xf32>
      tpu.vector_store %arg7[%c0_53, %c0_54, %c0_55], %92 {strides = array<i32>} : memref<1x16x128xf32, #tpu.memory_space<vmem>>, vector<1x16x128xf32>,
    } else {
    }
    return
  }
  func.func @transform_0(%arg0: i32, %arg1: i32) -> (i32, i32, i32) {
    %c0_i32 = arith.constant 0 : i32
    %c0_i32_0 = arith.constant 0 : i32
    %c0_i32_1 = arith.constant 0 : i32
    return %arg0, %c0_i32, %c0_i32_0 : i32, i32, i32
  }
  func.func @transform_1(%arg0: i32, %arg1: i32) -> (i32, i32, i32) {
    %c0_i32 = arith.constant 0 : i32
    %c0_i32_0 = arith.constant 0 : i32
    return %arg0, %c0_i32, %arg1 : i32, i32, i32
  }
  func.func @transform_2(%arg0: i32, %arg1: i32) -> (i32, i32) {
    %c0_i32 = arith.constant 0 : i32
    %c0_i32_0 = arith.constant 0 : i32
    return %c0_i32, %arg1 : i32, i32
  }
  func.func @transform_3(%arg0: i32, %arg1: i32) -> (i32, i32) {
    %c0_i32 = arith.constant 0 : i32
    %c0_i32_0 = arith.constant 0 : i32
    return %arg1, %c0_i32 : i32, i32
  }
  func.func @transform_4(%arg0: i32, %arg1: i32) -> (i32, i32) {
    %c0_i32 = arith.constant 0 : i32
    %c0_i32_0 = arith.constant 0 : i32
    %c0_i32_1 = arith.constant 0 : i32
    return %c0_i32, %c0_i32_0 : i32, i32
  }
  func.func @transform_5(%arg0: i32, %arg1: i32) -> (i32, i32, i32) {
    %c0_i32 = arith.constant 0 : i32
    %c0_i32_0 = arith.constant 0 : i32
    %c0_i32_1 = arith.constant 0 : i32
    return %arg0, %c0_i32, %c0_i32_0 : i32, i32, i32
  }
}

</mosaic_0001>

<bundles_post_ra>
// kernel: loss_multi_nce_forward.41
= control target key start
LH: loop header
LB: loop body
LE: loop exit
PB: predicated region body
PF: predicated region fallthrough
CT: control target
= control target key end

     0   :  { %s958_s18 = smov 0   ;;  %s960_s19 = smov 0   ;;  %s1104_s0 = inlined_call_operand.vmem [shape: bf16[2,16,32], index: 0, kind: input, shape index: {}]   ;;  %s1105_s1 = inlined_call_operand.vmem [shape: bf16[2,32,128], index: 1, kind: input, shape index: {}]   ;;  %s1106_s2 = inlined_call_operand.vmem [shape: s32[1,128], index: 2, kind: input, shape index: {}]   ;;  %s1107_s3 = inlined_call_operand.vmem [shape: f32[128,128], index: 3, kind: input, shape index: {}]   ;;  %s1108_s4 = inlined_call_operand.vmem [shape: s32[16,1], index: 4, kind: input, shape index: {}]   ;;  %s1109_s5 = inlined_call_operand.vmem [shape: f32[2,16,128], index: 5, kind: output, shape index: {}]  }
   0x1   :  { %s962_s20 = smov 0  }
   0x2 LB: > { %s27_s21 = sadd.s32 1, %s918_s19  ;;  %p765_p0 = scmp.ge.s32.totalorder %s922_s20, 1  ;;  %s922_s20 = sphi %s962_s20, %s15_s20   ;;  %s918_s19 = sphi %s960_s19, %s1115_s19   ;;  %s914_s18 = sphi %s958_s18, %s1114_s18  }
   0x3   : > { %p29_p1 = scmp.ge.s32.totalorder %s27_s21, 2  ;;  %p233_p2 = scmp.lt.s32.totalorder %s922_s20, 3 }
   0x5   : > { %s1117_s21 = smov (%p29_p1, %s27_s21), 0  ;;  %p234_p3 = pnand %p765_p0, %p233_p2 }
   0x6   : > { %p277_p4 = scmp.lt.s32.totalorder (!%p234_p3), %s914_s18, 1 }
   0x7   : > { %237 = sbr.rel (%p234_p3) target bundleno = 979 (0x3d3), region = 40 }
   0xc   : > { %v408_v0 = vld [vmem:[%s1108_s4] sm:$0xff]  ;;  %v924_v1 = vmov 0.0   ;;  %vm925_vm0 = vmmov 0   ;;  %v498_v2 = vld [vmem:[%s1107_s3 + $0x78] sm:$0xff]  ;;  %v497_v3 = vld [vmem:[%s1107_s3 + $0x70] sm:$0xff]  ;;  %s1119_s18 = smov (!%p277_p4, %s914_s18), 1  ;;  %v410_v24 = vlaneseq }
   0xd   : > { %804 = vmatprep.subr.bf16.mxu0 %v924_v1  ;;  %808 = vmatprep.mubr.msk.bf16.mxu0 %vm925_vm0, %v924_v1  ;;  %v926_v4 = vmov 0   ;;  %v496_v5 = vld [vmem:[%s1107_s3 + $0x68] sm:$0xff]  ;;  %s781_s30 = sshll.u32 %s1119_s18, 4  ;;  %s780_s6 = sshll.u32 %s1119_s18, 3  ;;  %v495_v7 = vld [vmem:[%s1107_s3 + $0x60] sm:$0xff]  ;;  %vm341_vm1 = vcmask 261120  }
   0xe   : > { %875 = vset.pattern.permute.xlu0 %v926_v4  ;;  %812 = vmatprep.subr.mxu1 %v498_v2  ;;  %v409_v6 = vld [vmem:[%s1108_s4 + $0x8] sm:$0xff]  ;;  %s289_s11 = scalar_lea.vmem %s1105_s1, %s781_s30  ;;  %s281_s16 = scalar_lea.vmem %s1104_s0, %s780_s6  ;;  %v494_v11 = vld [vmem:[%s1107_s3 + $0x58] sm:$0xff]  ;;  %v493_v12 = vld [vmem:[%s1107_s3 + $0x50] sm:$0xff]  ;;  %vm309_vm2 = vcmask 7168   ;;  %v927_v23 = vmov -inf   ;;  %v411_v30 = vshrl.u32 %v410_v24, 7 }
   0xf   : > { %415 = vperm.xlu0 %875, %v408_v0   ;;  %813 = vmatpush3.msra.mxu1 %v498_v2  ;;  %v877_v8 = vld [vmem:[%s289_s11 + $0x8] sm:$0xff]   ;;  %v878_v9 = vld [vmem:[%s289_s11] sm:$0xff]   ;;  %v490_v15 = vld [vmem:[%s1107_s3 + $0x38] sm:$0xff]  ;;  %310 = vst.msk [vmem:[#allocation2] sm:$0xff] %vm309_vm2, %v927_v23  ;;  %s303_s29 = scalar_lea.vmem %s1109_s5, %s781_s30 }
  0x10   : > { %814 = vmatprep.subr.mxu1 %v497_v3  ;;  %876 = vset.pattern.permute.xlu1 %v926_v4  ;;  %v879_v10 = vld [vmem:[%s281_s16] sm:$0xff]   ;;  %v492_v13 = vld [vmem:[%s1107_s3 + $0x48] sm:$0xff]  ;;  %v489_v16 = vld [vmem:[%s1107_s3 + $0x30] sm:$0xff]  ;;  %311 = vst.msk [vmem:[#allocation2 + $0x8] sm:$0xff] %vm309_vm2, %v927_v23  ;;  %v412_v35 = vsub.s32 0, %v411_v30 }
  0x11   : > { %815 = vmatpush3.msra.mxu1 %v497_v3  ;;  %805 = vmatpush3.bf16.msra.mxu0 %v877_v8  ;;  %v491_v14 = vld [vmem:[%s1107_s3 + $0x40] sm:$0xff]  ;;  %v488_v17 = vld [vmem:[%s1107_s3 + $0x28] sm:$0xff]  ;;  %v486_v19 = vld [vmem:[%s1107_s3 + $0x18] sm:$0xff]  ;;  %312 = vst.msk [vmem:[#allocation3] sm:$0xff] %vm309_vm2, %v924_v1 }
  0x12   : > { %816 = vmatprep.subr.mxu1 %v496_v5  ;;  %806 = vmatprep.subr.bf16.mxu0 %v924_v1  ;;  %v487_v18 = vld [vmem:[%s1107_s3 + $0x20] sm:$0xff]  ;;  %v485_v20 = vld [vmem:[%s1107_s3 + $0x10] sm:$0xff]  ;;  %v484_v21 = vld [vmem:[%s1107_s3 + $0x8] sm:$0xff]  ;;  %313 = vst.msk [vmem:[#allocation3 + $0x8] sm:$0xff] %vm309_vm2, %v924_v1 }
  0x13   : > { %418 = vperm.xlu0 %875, %v409_v6   ;;  %817 = vmatpush3.msra.mxu1 %v496_v5  ;;  %v483_v22 = vld [vmem:[%s1107_s3] sm:$0xff]  ;;  %314 = vst.msk [vmem:[#allocation4] sm:$0xff] %vm309_vm2, %v924_v1  ;;  %315 = vst.msk [vmem:[#allocation4 + $0x8] sm:$0xff] %vm309_vm2, %v924_v1 }
  0x14   : > { %818 = vmatprep.subr.mxu1 %v495_v7  ;;  %v407_v28 = vld [vmem:[%s1106_s2] sm:$0x1] }
  0x15   : > { %819 = vmatpush3.msra.mxu1 %v495_v7  ;;  %807 = vmatpush3.bf16.msra.mxu0 %v878_v9  ;;  %vm422_vm3 = vcmp.lt.s32.totalorder %v407_v28, 0  ;;  %v413_v37 = vrot.slane %v407_v28, %v412_v35 }
  0x16   : > { %820 = vmatprep.subr.mxu1 %v494_v11  ;;  %v423_v36 = vsel %vm422_vm3, 1, %v926_v4  ;;  %v433_v49 = vld [vmem:[#allocation2] sm:$0xff] }
  0x17   : > { %821 = vmatpush3.msra.mxu1 %v494_v11  ;;  %v427_v38 = vrot.slane %v423_v36, %v412_v35  ;;  %v434_v52 = vld [vmem:[#allocation2 + $0x8] sm:$0xff] }
  0x18   : > { %809 = vmatmul.mubr.msk.bf16.vlgmr.msra.gmra.mxu0 %vm341_vm1, %v879_v10  ;;  %822 = vmatprep.subr.mxu1 %v493_v12  ;;  %v465_v9 = vld [vmem:[#allocation3] sm:$0xff] }
  0x19   : > { %823 = vmatpush3.msra.mxu1 %v493_v12  ;;  %vm428_vm5 = vcmp.eq.s32.totalorder %v427_v38, 1 }
  0x1a   : > { %824 = vmatprep.subr.mxu1 %v492_v13 }
  0x1b   : > { %825 = vmatpush3.msra.mxu1 %v492_v13  ;;  %v466_v13 = vld [vmem:[#allocation3 + $0x8] sm:$0xff] }
  0x1c   : > { %826 = vmatprep.subr.mxu1 %v491_v14 }
  0x1d   : > { %827 = vmatpush3.msra.mxu1 %v491_v14 }
  0x1e   : > { %828 = vmatprep.subr.mxu1 %v490_v15 }
  0x1f   : > { %829 = vmatpush3.msra.mxu1 %v490_v15 }
  0x20   : > { %830 = vmatprep.subr.mxu1 %v489_v16 }
  0x21   : > { %831 = vmatpush3.msra.mxu1 %v489_v16 }
  0x22   : > { %832 = vmatprep.subr.mxu1 %v488_v17 }
  0x23   : > { %833 = vmatpush3.msra.mxu1 %v488_v17 }
  0x24   : > { %834 = vmatprep.subr.mxu1 %v487_v18 }
  0x25   : > { %835 = vmatpush3.msra.mxu1 %v487_v18 }
  0x26   : > { %836 = vmatprep.subr.mxu1 %v486_v19 }
  0x27   : > { %837 = vmatpush3.msra.mxu1 %v486_v19 }
  0x28   : > { %838 = vmatprep.subr.mxu1 %v485_v20 }
  0x29   : > { %839 = vmatpush3.msra.mxu1 %v485_v20 }
  0x2a   : > { %840 = vmatprep.subr.mxu1 %v484_v21 }
  0x2b   : > { %841 = vmatpush3.msra.mxu1 %v484_v21 }
  0x2c   : > { %842 = vmatprep.subr.mxu1 %v483_v22 }
  0x2d   : > { %843 = vmatpush3.msra.mxu1 %v483_v22  ;;  %v389_v22 = vld [vmem:[#allocation4 + $0x8] sm:$0xff] }
  0x8a   : > { %v416_v39 = vpop.permute.xlu0 %415 }
  0x8b   : > { %vm420_vm4 = vcmp.eq.s32.totalorder %v413_v37, %v416_v39 }
  0x8c   : > { %vm1065_vm6 = vmor %vm420_vm4, %vm428_vm5 }
  0x8e   : > { %v419_v41 = vpop.permute.xlu0 %418 }
  0x8f   : > { %vm421_vm7 = vcmp.eq.s32.totalorder %v413_v37, %v419_v41 }
  0x90   : > { %vm1071_vm8 = vmor %vm421_vm7, %vm428_vm5 }
  0xd8   : > { %v379_v25 = vpop.f32.mrf.mxu0 }
  0xd9   : > { %v1057_v26 = vmul.f32 0.17677669, %v379_v25 }
  0xda   : > { %v810_v27 = vpop.f32.mrf.mxu0 }
  0xdb   : > { %v401_v29 = vmul.f32 0.1, %v1057_v26  ;;  %v390_v20 = vmul.f32 %v1057_v26, %v1057_v26 }
  0xdc   : > { %v382_v31 = vpop.f32.mrf.mxu0 }
  0xdd   : > { %880 = vtanh.f32 %v401_v29  ;;  %v387_v32 = vmul.f32 0.17677669, %v382_v31 }
  0xde   : > { %v811_v33 = vpop.f32.mrf.mxu0 }
  0xdf   : > { %v402_v34 = vmul.f32 0.1, %v387_v32  ;;  %v391_v5 = vmul.f32 %v387_v32, %v387_v32 }
  0xe1   : > { %882 = vtanh.f32 %v402_v34 }
  0xea   : > { %v881_v40 = vpop.eup %880 }
  0xeb   : > { %v405_v43 = vmul.f32 10.0, %v881_v40  ;;  %v622_v40 = vand.u32 127, %v410_v24 }
  0xed   : > { %844 = vmatprep.mubr.msk.f32.mxu1 %vm420_vm4, %v405_v43  ;;  %v431_v44 = vsel %vm1065_vm6, -10.0, %v405_v43  ;;  %vm623_vm9 = vcmp.lt.s32.totalorder %v622_v40, 49  ;;  %vm631_vm10 = vcmp.eq.s32.totalorder %v622_v40, 1  ;;  %vm630_vm11 = vcmp.eq.s32.totalorder %v622_v40, 0 }
  0xee   : > { %v883_v45 = vpop.eup %882  ;;  %435 = vmax.xlane.f32.xlu1 %v431_v44 }
  0xef   : > { %v406_v46 = vmul.f32 10.0, %v883_v45 }
  0xf1   : > { %845 = vmatmul.mubr.msk.f32.vlgmr.msra.gmra.mxu1 %vm421_vm7, %v406_v46  ;;  %v432_v48 = vsel %vm1071_vm8, -10.0, %v406_v46 }
  0xf2   : > { %437 = vmax.xlane.f32.xlu1 %v432_v48 }
 0x177   : > { %v436_v50 = vpop.xlane.xlu1 %435 }
 0x178   : > { %v439_v51 = vmax.f32 %v433_v49, %v436_v50 }
 0x17a   : > { %v459_v53 = vsub.f32 %v433_v49, %v439_v51  ;;  %477 = vst.msk [vmem:[#allocation2] sm:$0xff] %vm309_vm2, %v439_v51  ;;  %443 = vperm.xlu0 %875, %v439_v51   ;;  %v388_v49 = vld [vmem:[#allocation4] sm:$0xff] }
 0x17b   : > { %v438_v54 = vpop.xlane.xlu1 %437 }
 0x17c   : > { %v440_v55 = vmax.f32 %v434_v52, %v438_v54  ;;  %v461_v6 = vmul.f32 1.442695, %v459_v53 }
 0x17e   : > { %v460_v56 = vsub.f32 %v434_v52, %v440_v55  ;;  %478 = vst.msk [vmem:[#allocation2 + $0x8] sm:$0xff] %vm309_vm2, %v440_v55  ;;  %448 = vperm.xlu1 %876, %v440_v55  }
 0x180   : > { %v463_v7 = vmul.f32 1.442695, %v460_v56 }
 0x181   : > { %v583_v4 = vld [vmem:[#allocation2] sm:$0xff] }
 0x185   : > { %v584_v3 = vld [vmem:[#allocation2 + $0x8] sm:$0xff] }
 0x1b1   : > { %v846_v28 = vpop.f32.mrf.mxu1 }
 0x1b3   : > { %v565_v30 = vpop.f32.mrf.mxu1 }
 0x1f5   : > { %v444_v57 = vpop.permute.xlu0 %443 }
 0x1f6   : > { %v451_v58 = vsub.f32 %v431_v44, %v444_v57 }
 0x1f8   : > { %v453_v59 = vmul.f32 1.442695, %v451_v58 }
 0x1f9   : > { %v449_v60 = vpop.permute.xlu1 %448 }
 0x1fa   : > { %884 = vpow2.f32 %v453_v59  ;;  %v452_v61 = vsub.f32 %v432_v48, %v449_v60 }
 0x1fc   : > { %v455_v62 = vmul.f32 1.442695, %v452_v61 }
 0x1fe   : > { %886 = vpow2.f32 %v455_v62 }
 0x1ff   : > { %888 = vpow2.f32 %v461_v6 }
 0x200   : > { %890 = vpow2.f32 %v463_v7 }
 0x207   : > { %v885_v63 = vpop.eup %884 }
 0x208   : > { %v457_v0 = vsel %vm1065_vm6, 0.0, %v885_v63 }
 0x209   : > { %469 = vadd.xlane.f32.xlu0 %v457_v0 }
 0x20b   : > { %v887_v1 = vpop.eup %886 }
 0x20c   : > { %v458_v2 = vsel %vm1071_vm8, 0.0, %v887_v1  ;;  %v889_v8 = vpop.eup %888 }
 0x20d   : > { %471 = vadd.xlane.f32.xlu1 %v458_v2  ;;  %v467_v10 = vmul.f32 %v889_v8, %v465_v9  ;;  %v891_v11 = vpop.eup %890 }
 0x20e   : > { %v468_v15 = vmul.f32 %v891_v11, %v466_v13 }
 0x21e   : > { %592 = vperm.xlu1 %876, %v584_v3  }
 0x21f   : > { %587 = vperm.xlu0 %875, %v583_v4  }
 0x242   : > { %394 = vadd.xlane.f32.xlu1 %v391_v5 }
 0x292   : > { %v470_v12 = vpop.xlane.xlu0 %469 }
 0x293   : > { %v473_v14 = vadd.f32 %v470_v12, %v467_v10 }
 0x295   : > { %475 = vst.msk [vmem:[#allocation3] sm:$0xff] %vm309_vm2, %v473_v14 }
 0x296   : > { %v472_v16 = vpop.xlane.xlu1 %471 }
 0x297   : > { %v474_v17 = vadd.f32 %v472_v16, %v468_v15 }
 0x299   : > { %476 = vst.msk [vmem:[#allocation3 + $0x8] sm:$0xff] %vm309_vm2, %v474_v17 }
 0x29a   : > { %v593_v21 = vpop.permute.xlu1 %592  ;;  %v588_v29 = vpop.permute.xlu0 %587 }
 0x29b   : > { %v595_v31 = vsub.f32 %v565_v30, %v588_v29  ;;  %v596_v33 = vsub.f32 %v846_v28, %v593_v21 }
 0x29c   : > { %v601_v18 = vld [vmem:[#allocation3] sm:$0xff] }
 0x29d   : > { %605 = vperm.xlu0 %875, %v601_v18   ;;  %v597_v32 = vmul.f32 1.442695, %v595_v31  ;;  %v599_v34 = vmul.f32 1.442695, %v596_v33 }
 0x29f   : > { %892 = vpow2.f32 %v597_v32 }
 0x2a0   : > { %v602_v19 = vld [vmem:[#allocation3 + $0x8] sm:$0xff]  ;;  %894 = vpow2.f32 %v599_v34 }
 0x2a1   : > { %610 = vperm.xlu0 %875, %v602_v19  }
 0x2ac   : > { %v893_v35 = vpop.eup %892 }
 0x2ad   : > { %v895_v37 = vpop.eup %894 }
 0x2c0   : > { %392 = vadd.xlane.f32.xlu0 %v390_v20 }
 0x2cb   : > { %v395_v23 = vpop.xlane.xlu1 %394 }
 0x2cc   : > { %v397_v25 = vadd.f32 %v395_v23, %v389_v22 }
 0x2ce   : > { %400 = vst.msk [vmem:[#allocation4 + $0x8] sm:$0xff] %vm309_vm2, %v397_v25 }
 0x2d5   : > { %v633_v27 = vld [vmem:[#allocation4 + $0x8] sm:$0xff] }
 0x2d6   : > { %641 = vperm.xlu1 %876, %v633_v27  }
 0x318   : > { %v606_v26 = vpop.permute.xlu0 %605 }
 0x319   : > { %v613_v36 = vadd.f32 %v893_v35, %v606_v26 }
 0x31b   : > { %896 = vlog2.f32 %v613_v36 }
 0x31c   : > { %v611_v38 = vpop.permute.xlu0 %610 }
 0x31d   : > { %v614_v39 = vadd.f32 %v895_v37, %v611_v38 }
 0x31f   : > { %898 = vlog2.f32 %v614_v39 }
 0x328   : > { %v897_v41 = vpop.eup %896 }
 0x329   : > { %v616_v42 = vmul.f32 0.6931472, %v897_v41 }
 0x32b   : > { %v619_v43 = vsub.f32 %v595_v31, %v616_v42 }
 0x32c   : > { %v899_v44 = vpop.eup %898 }
 0x32d   : > { %v624_v45 = vsel %vm623_vm9, %v619_v43, 0.0  ;;  %v618_v46 = vmul.f32 0.6931472, %v899_v44 }
 0x32e   : > { %626 = vadd.xlane.f32.xlu0 %v624_v45 }
 0x32f   : > { %v620_v47 = vsub.f32 %v596_v33, %v618_v46 }
 0x331   : > { %v625_v48 = vsel %vm623_vm9, %v620_v47, 0.0 }
 0x332   : > { %628 = vadd.xlane.f32.xlu0 %v625_v48 }
 0x349   : > { %v393_v50 = vpop.xlane.xlu0 %392 }
 0x34a   : > { %v396_v51 = vadd.f32 %v393_v50, %v388_v49 }
 0x34c   : > { %399 = vst.msk [vmem:[#allocation4] sm:$0xff] %vm309_vm2, %v396_v51 }
 0x351   : > { %v642_v53 = vpop.permute.xlu1 %641 }
 0x352   : > { %v645_v54 = vsel %vm631_vm10, %v642_v53, 0.0 }
 0x353   : > { %v632_v52 = vld [vmem:[#allocation4] sm:$0xff] }
 0x354   : > { %636 = vperm.xlu0 %875, %v632_v52  }
 0x3b7   : > { %v627_v24 = vpop.xlane.xlu0 %626 }
 0x3bb   : > { %v629_v55 = vpop.xlane.xlu0 %628 }
 0x3bc   : > { %v647_v56 = vsel %vm630_vm11, %v629_v55, %v645_v54 }
 0x3bd   : > { %649 = vst [vmem:[%s303_s29 + $0x8] sm:$0xff] %v647_v56 }
 0x3cf   : > { %v637_v57 = vpop.permute.xlu0 %636 }
 0x3d0   : > { %v644_v58 = vsel %vm631_vm10, %v637_v57, 0.0 }
 0x3d1   : > { %v646_v59 = vsel %vm630_vm11, %v627_v24, %v644_v58 }
 0x3d2   : > { %648 = vst [vmem:[%s303_s29] sm:$0xff] %v646_v59 }
 0x3d3 PF: > { %s15_s20 = sadd.s32 1, %s922_s20   ;;  %s1114_s18 = smov %s918_s19 }
 0x3d4   : > { %p12_p5 = scmp.ge.s32.totalorder %s15_s20, 4   ;;  %s1115_s19 = smov %s1117_s21 }
 0x3d6   :  { %14 = sbr.rel (!%p12_p5) target bundleno = 2 (0x2), region = 87 }

// kernel: loss_multi_nce_forward.40
= control target key start
LH: loop header
LB: loop body
LE: loop exit
PB: predicated region body
PF: predicated region fallthrough
CT: control target
= control target key end

     0   :  { %s1175_s18 = smov 0   ;;  %s1177_s19 = smov 0   ;;  %s1394_s0 = inlined_call_operand.vmem [shape: bf16[2,32,32], index: 0, kind: input, shape index: {}]   ;;  %s1395_s1 = inlined_call_operand.vmem [shape: bf16[2,32,128], index: 1, kind: input, shape index: {}]   ;;  %s1396_s2 = inlined_call_operand.vmem [shape: s32[1,128], index: 2, kind: input, shape index: {}]   ;;  %s1397_s3 = inlined_call_operand.vmem [shape: f32[128,128], index: 3, kind: input, shape index: {}]   ;;  %s1398_s4 = inlined_call_operand.vmem [shape: s32[32,1], index: 4, kind: input, shape index: {}]   ;;  %s1399_s5 = inlined_call_operand.vmem [shape: f32[2,32,128], index: 5, kind: output, shape index: {}]  }
   0x1   :  { %s1179_s20 = smov 0  }
   0x2 LB: > { %s27_s21 = sadd.s32 1, %s1136_s19  ;;  %p953_p0 = scmp.ge.s32.totalorder %s1140_s20, 1  ;;  %s1140_s20 = sphi %s1179_s20, %s15_s20   ;;  %s1136_s19 = sphi %s1177_s19, %s1409_s19   ;;  %s1132_s18 = sphi %s1175_s18, %s1408_s18  }
   0x3   : > { %p29_p1 = scmp.ge.s32.totalorder %s27_s21, 2  ;;  %p233_p2 = scmp.lt.s32.totalorder %s1140_s20, 3 }
   0x5   : > { %s1411_s21 = smov (%p29_p1, %s27_s21), 0  ;;  %p234_p3 = pnand %p953_p0, %p233_p2 }
   0x6   : > { %p277_p4 = scmp.lt.s32.totalorder (!%p234_p3), %s1132_s18, 1 }
   0x7   : > { %237 = sbr.rel (%p234_p3) target bundleno = 994 (0x3e2), region = 40 }
   0xc   : > { %v454_v0 = vld [vmem:[%s1398_s4] sm:$0xff]  ;;  %v1142_v1 = vmov 0   ;;  %v456_v2 = vld [vmem:[%s1398_s4 + $0x10] sm:$0xff]  ;;  %s1413_s18 = smov (!%p277_p4, %s1132_s18), 1  ;;  %v608_v3 = vld [vmem:[%s1397_s3 + $0x78] sm:$0xff]  ;;  %vm356_vm0 = vcmask 261120   ;;  %v458_v29 = vlaneseq }
   0xd   : > { %1072 = vset.pattern.permute.xlu0 %v1142_v1  ;;  %1073 = vset.pattern.permute.xlu1 %v1142_v1  ;;  %v607_v4 = vld [vmem:[%s1397_s3 + $0x70] sm:$0xff]  ;;  %v455_v5 = vld [vmem:[%s1398_s4 + $0x8] sm:$0xff]  ;;  %v457_v6 = vld [vmem:[%s1398_s4 + $0x18] sm:$0xff]  ;;  %s972_s9 = sshll.u32 %s1413_s18, 4  ;;  %vm309_vm1 = vcmask 7168   ;;  %v1143_v25 = vmov -inf  }
   0xe   : > { %463 = vperm.xlu0 %1072, %v454_v0   ;;  %469 = vperm.xlu1 %1073, %v456_v2   ;;  %s289_s12 = scalar_lea.vmem %s1395_s1, %s972_s9  ;;  %s281_s15 = scalar_lea.vmem %s1394_s0, %s972_s9  ;;  %v606_v7 = vld [vmem:[%s1397_s3 + $0x68] sm:$0xff]  ;;  %v605_v12 = vld [vmem:[%s1397_s3 + $0x60] sm:$0xff]  ;;  %v604_v13 = vld [vmem:[%s1397_s3 + $0x58] sm:$0xff]  ;;  %310 = vst.msk [vmem:[#allocation2] sm:$0xff] %vm309_vm1, %v1143_v25  ;;  %v459_v37 = vshrl.u32 %v458_v29, 7 }
   0xf   : > { %1007 = vmatprep.subr.mxu1 %v608_v3  ;;  %v1074_v8 = vld [vmem:[%s289_s12 + $0x8] sm:$0xff]   ;;  %v1075_v9 = vld [vmem:[%s289_s12] sm:$0xff]   ;;  %v603_v14 = vld [vmem:[%s1397_s3 + $0x50] sm:$0xff]  ;;  %311 = vst.msk [vmem:[#allocation2 + $0x8] sm:$0xff] %vm309_vm1, %v1143_v25  ;;  %s974_s29 = sshll.u32 %s1413_s18, 5 }
  0x10   : > { %1008 = vmatpush3.msra.mxu1 %v608_v3  ;;  %999 = vmatprep.subr.bf16.mxu0 %v1074_v8  ;;  %v1076_v10 = vld [vmem:[%s281_s15] sm:$0xff]   ;;  %v1077_v11 = vld [vmem:[%s281_s15 + $0x8] sm:$0xff]   ;;  %v600_v17 = vld [vmem:[%s1397_s3 + $0x38] sm:$0xff]  ;;  %312 = vst.msk [vmem:[#allocation2 + $0x10] sm:$0xff] %vm309_vm1, %v1143_v25  ;;  %v460_v41 = vsub.s32 0, %v459_v37  ;;  %s303_s7 = scalar_lea.vmem %s1399_s5, %s974_s29 }
  0x11   : > { %1009 = vmatprep.subr.mxu1 %v607_v4  ;;  %1000 = vmatpush3.bf16.msra.mxu0 %v1074_v8  ;;  %v602_v15 = vld [vmem:[%s1397_s3 + $0x48] sm:$0xff]  ;;  %v601_v16 = vld [vmem:[%s1397_s3 + $0x40] sm:$0xff]  ;;  %v599_v18 = vld [vmem:[%s1397_s3 + $0x30] sm:$0xff]  ;;  %313 = vst.msk [vmem:[#allocation2 + $0x18] sm:$0xff] %vm309_vm1, %v1143_v25 }
  0x12   : > { %466 = vperm.xlu0 %1072, %v455_v5   ;;  %472 = vperm.xlu1 %1073, %v457_v6   ;;  %v598_v19 = vld [vmem:[%s1397_s3 + $0x28] sm:$0xff]  ;;  %v597_v20 = vld [vmem:[%s1397_s3 + $0x20] sm:$0xff]  ;;  %v596_v21 = vld [vmem:[%s1397_s3 + $0x18] sm:$0xff] }
  0x13   : > { %1010 = vmatpush3.msra.mxu1 %v607_v4  ;;  %1001 = vmatprep.subr.bf16.mxu0 %v1075_v9  ;;  %v595_v22 = vld [vmem:[%s1397_s3 + $0x10] sm:$0xff]  ;;  %v594_v23 = vld [vmem:[%s1397_s3 + $0x8] sm:$0xff]  ;;  %v593_v24 = vld [vmem:[%s1397_s3] sm:$0xff] }
  0x14   : > { %1011 = vmatprep.subr.mxu1 %v606_v7  ;;  %1003 = vmatprep.mubr.msk.bf16.mxu0 %vm356_vm0, %v1076_v10  ;;  %v453_v35 = vld [vmem:[%s1396_s2] sm:$0x1] }
  0x15   : > { %1012 = vmatpush3.msra.mxu1 %v606_v7  ;;  %1002 = vmatpush3.bf16.msra.mxu0 %v1075_v9  ;;  %vm478_vm2 = vcmp.lt.s32.totalorder %v453_v35, 0  ;;  %v461_v44 = vrot.slane %v453_v35, %v460_v41  ;;  %v493_v2 = vld [vmem:[#allocation2] sm:$0xff] }
  0x16   : > { %1013 = vmatprep.subr.mxu1 %v605_v12  ;;  %v479_v42 = vsel %vm478_vm2, 1, %v1142_v1  ;;  %v1144_v1 = vmov 0.0   ;;  %v494_v7 = vld [vmem:[#allocation2 + $0x8] sm:$0xff] }
  0x17   : > { %1014 = vmatpush3.msra.mxu1 %v605_v12  ;;  %v483_v45 = vrot.slane %v479_v42, %v460_v41  ;;  %314 = vst.msk [vmem:[#allocation3] sm:$0xff] %vm309_vm1, %v1144_v1  ;;  %315 = vst.msk [vmem:[#allocation3 + $0x8] sm:$0xff] %vm309_vm1, %v1144_v1  ;;  %v495_v5 = vld [vmem:[#allocation2 + $0x10] sm:$0xff] }
  0x18   : > { %1004 = vmatmul.mubr.msk.bf16.vlgmr.msra.gmra.mxu0 %vm356_vm0, %v1077_v11  ;;  %1015 = vmatprep.subr.mxu1 %v604_v13  ;;  %316 = vst.msk [vmem:[#allocation3 + $0x10] sm:$0xff] %vm309_vm1, %v1144_v1  ;;  %317 = vst.msk [vmem:[#allocation3 + $0x18] sm:$0xff] %vm309_vm1, %v1144_v1  ;;  %v496_v12 = vld [vmem:[#allocation2 + $0x18] sm:$0xff] }
  0x19   : > { %1016 = vmatpush3.msra.mxu1 %v604_v13  ;;  %vm484_vm4 = vcmp.eq.s32.totalorder %v483_v45, 1  ;;  %318 = vst.msk [vmem:[#allocation4] sm:$0xff] %vm309_vm1, %v1144_v1  ;;  %319 = vst.msk [vmem:[#allocation4 + $0x8] sm:$0xff] %vm309_vm1, %v1144_v1 }
  0x1a   : > { %1017 = vmatprep.subr.mxu1 %v603_v14  ;;  %320 = vst.msk [vmem:[#allocation4 + $0x10] sm:$0xff] %vm309_vm1, %v1144_v1  ;;  %321 = vst.msk [vmem:[#allocation4 + $0x18] sm:$0xff] %vm309_vm1, %v1144_v1 }
  0x1b   : > { %1018 = vmatpush3.msra.mxu1 %v603_v14 }
  0x1c   : > { %1019 = vmatprep.subr.mxu1 %v602_v15 }
  0x1d   : > { %1020 = vmatpush3.msra.mxu1 %v602_v15 }
  0x1e   : > { %1021 = vmatprep.subr.mxu1 %v601_v16  ;;  %v558_v59 = vld [vmem:[#allocation3 + $0x8] sm:$0xff] }
  0x1f   : > { %1022 = vmatpush3.msra.mxu1 %v601_v16 }
  0x20   : > { %1023 = vmatprep.subr.mxu1 %v600_v17 }
  0x21   : > { %1024 = vmatpush3.msra.mxu1 %v600_v17 }
  0x22   : > { %1025 = vmatprep.subr.mxu1 %v599_v18 }
  0x23   : > { %1026 = vmatpush3.msra.mxu1 %v599_v18 }
  0x24   : > { %1027 = vmatprep.subr.mxu1 %v598_v19 }
  0x25   : > { %1028 = vmatpush3.msra.mxu1 %v598_v19 }
  0x26   : > { %1029 = vmatprep.subr.mxu1 %v597_v20 }
  0x27   : > { %1030 = vmatpush3.msra.mxu1 %v597_v20 }
  0x28   : > { %1031 = vmatprep.subr.mxu1 %v596_v21 }
  0x29   : > { %1032 = vmatpush3.msra.mxu1 %v596_v21 }
  0x2a   : > { %1033 = vmatprep.subr.mxu1 %v595_v22 }
  0x2b   : > { %1034 = vmatpush3.msra.mxu1 %v595_v22 }
  0x2c   : > { %1035 = vmatprep.subr.mxu1 %v594_v23 }
  0x2d   : > { %1036 = vmatpush3.msra.mxu1 %v594_v23 }
  0x2e   : > { %1037 = vmatprep.subr.mxu1 %v593_v24 }
  0x2f   : > { %1038 = vmatpush3.msra.mxu1 %v593_v24 }
  0x89   : > { %v464_v43 = vpop.permute.xlu0 %463  ;;  %v470_v46 = vpop.permute.xlu1 %469 }
  0x8a   : > { %vm474_vm3 = vcmp.eq.s32.totalorder %v461_v44, %v464_v43  ;;  %vm476_vm6 = vcmp.eq.s32.totalorder %v461_v44, %v470_v46 }
  0x8b   : > { %vm1286_vm5 = vmor %vm474_vm3, %vm484_vm4 }
  0x8c   : > { %vm1294_vm8 = vmor %vm476_vm6, %vm484_vm4 }
  0x8d   : > { %v467_v49 = vpop.permute.xlu0 %466  ;;  %v473_v52 = vpop.permute.xlu1 %472 }
  0x8e   : > { %vm475_vm7 = vcmp.eq.s32.totalorder %v461_v44, %v467_v49  ;;  %vm477_vm9 = vcmp.eq.s32.totalorder %v461_v44, %v473_v52 }
  0x8f   : > { %vm1299_vm10 = vmor %vm475_vm7, %vm484_vm4 }
  0x90   : > { %vm1309_vm11 = vmor %vm477_vm9, %vm484_vm4 }
  0xd8   : > { %v1005_v26 = vpop.f32.mrf.mxu0 }
  0xd9   : > { %v1268_v27 = vmul.f32 0.17677669, %v1005_v26 }
  0xda   : > { %v397_v28 = vpop.f32.mrf.mxu0 }
  0xdb   : > { %v443_v30 = vmul.f32 0.1, %v1268_v27  ;;  %v1271_v31 = vmul.f32 0.17677669, %v397_v28 }
  0xdc   : > { %v1006_v32 = vpop.f32.mrf.mxu0 }
  0xdd   : > { %v441_v33 = vmul.f32 0.1, %v1271_v31  ;;  %v1274_v34 = vmul.f32 0.17677669, %v1006_v32  ;;  %1078 = vtanh.f32 %v443_v30  ;;  %v420_v43 = vmul.f32 %v1271_v31, %v1271_v31 }
  0xde   : > { %v400_v36 = vpop.f32.mrf.mxu0 }
  0xdf   : > { %1080 = vtanh.f32 %v441_v33  ;;  %v444_v38 = vmul.f32 0.1, %v1274_v34  ;;  %v1281_v39 = vmul.f32 0.17677669, %v400_v36 }
  0xe1   : > { %v442_v40 = vmul.f32 0.1, %v1281_v39  ;;  %1082 = vtanh.f32 %v444_v38 }
  0xe3   : > { %1084 = vtanh.f32 %v442_v40 }
  0xea   : > { %v1079_v47 = vpop.eup %1078 }
  0xeb   : > { %v451_v55 = vmul.f32 10.0, %v1079_v47 }
  0xec   : > { %v1081_v48 = vpop.eup %1080 }
  0xed   : > { %v449_v51 = vmul.f32 10.0, %v1081_v48  ;;  %v491_v61 = vsel %vm1294_vm8, -10.0, %v451_v55 }
  0xee   : > { %v1083_v53 = vpop.eup %1082 }
  0xef   : > { %1039 = vmatprep.mubr.msk.f32.mxu1 %vm474_vm3, %v449_v51  ;;  %v489_v54 = vsel %vm1286_vm5, -10.0, %v449_v51  ;;  %v452_v60 = vmul.f32 10.0, %v1083_v53  ;;  %v557_v53 = vld [vmem:[#allocation3] sm:$0xff] }
  0xf0   : > { %v1085_v56 = vpop.eup %1084  ;;  %497 = vmax.xlane.f32.xlu0 %v489_v54 }
  0xf1   : > { %v450_v58 = vmul.f32 10.0, %v1085_v56  ;;  %v492_v0 = vsel %vm1309_vm11, -10.0, %v452_v60  ;;  %v559_v56 = vld [vmem:[#allocation3 + $0x10] sm:$0xff] }
  0xf3   : > { %1040 = vmatmul.mubr.msk.f32.vlgmr.msra.gmra.mxu1 %vm475_vm7, %v450_v58  ;;  %v490_v62 = vsel %vm1299_vm10, -10.0, %v450_v58 }
  0xf4   : > { %501 = vmax.xlane.f32.xlu0 %v491_v61  ;;  %1042 = vmatprep.mubr.msk.f32.mxu1 %vm476_vm6, %v451_v55 }
  0xf5   : > { %499 = vmax.xlane.f32.xlu1 %v490_v62 }
  0xf7   : > { %1043 = vmatmul.mubr.msk.f32.gmra.mxu1 %vm477_vm9, %v452_v60 }
  0xf8   : > { %503 = vmax.xlane.f32.xlu0 %v492_v0 }
 0x179   : > { %v498_v3 = vpop.xlane.xlu0 %497 }
 0x17a   : > { %v505_v4 = vmax.f32 %v493_v2, %v498_v3 }
 0x17c   : > { %v545_v6 = vsub.f32 %v493_v2, %v505_v4  ;;  %581 = vst.msk [vmem:[#allocation2] sm:$0xff] %vm309_vm1, %v505_v4  ;;  %511 = vperm.xlu1 %1073, %v505_v4  }
 0x17d   : > { %v502_v8 = vpop.xlane.xlu0 %501 }
 0x17e   : > { %v507_v9 = vmax.f32 %v495_v5, %v502_v8  ;;  %v500_v10 = vpop.xlane.xlu1 %499  ;;  %v549_v48 = vmul.f32 1.442695, %v545_v6 }
 0x17f   : > { %v506_v11 = vmax.f32 %v494_v7, %v500_v10 }
 0x180   : > { %v547_v13 = vsub.f32 %v495_v5, %v507_v9  ;;  %583 = vst.msk [vmem:[#allocation2 + $0x10] sm:$0xff] %vm309_vm1, %v507_v9  ;;  %521 = vperm.xlu1 %1073, %v507_v9  }
 0x181   : > { %v546_v14 = vsub.f32 %v494_v7, %v506_v11  ;;  %582 = vst.msk [vmem:[#allocation2 + $0x8] sm:$0xff] %vm309_vm1, %v506_v11  ;;  %516 = vperm.xlu0 %1072, %v506_v11   ;;  %v504_v15 = vpop.xlane.xlu0 %503  ;;  %v416_v7 = vld [vmem:[#allocation4] sm:$0xff] }
 0x182   : > { %v508_v16 = vmax.f32 %v496_v12, %v504_v15  ;;  %v553_v49 = vmul.f32 1.442695, %v547_v13  ;;  %v423_v15 = vmul.f32 %v1274_v34, %v1274_v34 }
 0x183   : > { %v709_v44 = vld [vmem:[#allocation2] sm:$0xff]  ;;  %v551_v50 = vmul.f32 1.442695, %v546_v14  ;;  %v422_v14 = vmul.f32 %v1268_v27, %v1268_v27 }
 0x184   : > { %v548_v17 = vsub.f32 %v496_v12, %v508_v16  ;;  %584 = vst.msk [vmem:[#allocation2 + $0x18] sm:$0xff] %vm309_vm1, %v508_v16  ;;  %526 = vperm.xlu1 %1073, %v508_v16   ;;  %v421_v16 = vmul.f32 %v1281_v39, %v1281_v39 }
 0x186   : > { %v555_v51 = vmul.f32 1.442695, %v548_v17 }
 0x187   : > { %v711_v45 = vld [vmem:[#allocation2 + $0x10] sm:$0xff] }
 0x188   : > { %v710_v47 = vld [vmem:[#allocation2 + $0x8] sm:$0xff] }
 0x18b   : > { %v712_v46 = vld [vmem:[#allocation2 + $0x18] sm:$0xff] }
 0x1f7   : > { %v512_v18 = vpop.permute.xlu1 %511 }
 0x1f8   : > { %v529_v19 = vsub.f32 %v489_v54, %v512_v18  ;;  %v1041_v18 = vpop.f32.mrf.mxu1 }
 0x1fa   : > { %v533_v20 = vmul.f32 1.442695, %v529_v19 }
 0x1fb   : > { %v522_v21 = vpop.permute.xlu1 %521 }
 0x1fc   : > { %1086 = vpow2.f32 %v533_v20  ;;  %v517_v22 = vpop.permute.xlu0 %516  ;;  %v531_v23 = vsub.f32 %v491_v61, %v522_v21  ;;  %v675_v20 = vpop.f32.mrf.mxu1 }
 0x1fd   : > { %v530_v24 = vsub.f32 %v490_v62, %v517_v22 }
 0x1fe   : > { %v537_v25 = vmul.f32 1.442695, %v531_v23  ;;  %v1044_v21 = vpop.f32.mrf.mxu1 }
 0x1ff   : > { %v535_v26 = vmul.f32 1.442695, %v530_v24  ;;  %v527_v28 = vpop.permute.xlu1 %526 }
 0x200   : > { %1088 = vpow2.f32 %v537_v25  ;;  %v532_v30 = vsub.f32 %v492_v0, %v527_v28  ;;  %v560_v0 = vld [vmem:[#allocation3 + $0x18] sm:$0xff]  ;;  %v685_v23 = vpop.f32.mrf.mxu1 }
 0x201   : > { %1090 = vpow2.f32 %v535_v26 }
 0x202   : > { %v539_v32 = vmul.f32 1.442695, %v532_v30 }
 0x204   : > { %1092 = vpow2.f32 %v539_v32 }
 0x205   : > { %1094 = vpow2.f32 %v549_v48  ;;  %v1349_v48 = vand.u32 127, %v458_v29 }
 0x206   : > { %1096 = vpow2.f32 %v553_v49 }
 0x207   : > { %1098 = vpow2.f32 %v551_v50  ;;  %vm787_vm12 = vcmp.lt.s32.totalorder %v1349_v48, 25  ;;  %vm801_vm13 = vcmp.eq.s32.totalorder %v1349_v48, 1  ;;  %vm800_vm14 = vcmp.eq.s32.totalorder %v1349_v48, 0 }
 0x208   : > { %1100 = vpow2.f32 %v555_v51 }
 0x209   : > { %v1087_v33 = vpop.eup %1086 }
 0x20a   : > { %v541_v35 = vsel %vm1286_vm5, 0.0, %v1087_v33 }
 0x20b   : > { %565 = vadd.xlane.f32.xlu0 %v541_v35 }
 0x20d   : > { %v1089_v36 = vpop.eup %1088 }
 0x20e   : > { %v1091_v37 = vpop.eup %1090  ;;  %v543_v38 = vsel %vm1294_vm8, 0.0, %v1089_v36 }
 0x20f   : > { %v542_v40 = vsel %vm1299_vm10, 0.0, %v1091_v37  ;;  %569 = vadd.xlane.f32.xlu0 %v543_v38 }
 0x210   : > { %567 = vadd.xlane.f32.xlu1 %v542_v40 }
 0x211   : > { %v1093_v41 = vpop.eup %1092 }
 0x212   : > { %v544_v42 = vsel %vm1309_vm11, 0.0, %v1093_v41  ;;  %v1095_v52 = vpop.eup %1094 }
 0x213   : > { %571 = vadd.xlane.f32.xlu0 %v544_v42  ;;  %v561_v31 = vmul.f32 %v1095_v52, %v557_v53  ;;  %v1097_v54 = vpop.eup %1096 }
 0x214   : > { %v1099_v57 = vpop.eup %1098  ;;  %v563_v60 = vmul.f32 %v1097_v54, %v559_v56 }
 0x215   : > { %v1101_v61 = vpop.eup %1100  ;;  %v562_v63 = vmul.f32 %v1099_v57, %v558_v59 }
 0x216   : > { %v564_v4 = vmul.f32 %v1101_v61, %v560_v0 }
 0x217   : > { %424 = vadd.xlane.f32.xlu0 %v420_v43 }
 0x221   : > { %715 = vperm.xlu1 %1073, %v709_v44  }
 0x225   : > { %725 = vperm.xlu1 %1073, %v711_v45  }
 0x229   : > { %730 = vperm.xlu1 %1073, %v712_v46  }
 0x22d   : > { %720 = vperm.xlu0 %1072, %v710_v47  }
 0x294   : > { %v566_v55 = vpop.xlane.xlu0 %565 }
 0x295   : > { %v573_v58 = vadd.f32 %v566_v55, %v561_v31 }
 0x297   : > { %577 = vst.msk [vmem:[#allocation3] sm:$0xff] %vm309_vm1, %v573_v58 }
 0x298   : > { %v570_v62 = vpop.xlane.xlu0 %569 }
 0x299   : > { %v575_v1 = vadd.f32 %v570_v62, %v563_v60  ;;  %v568_v2 = vpop.xlane.xlu1 %567 }
 0x29a   : > { %v574_v3 = vadd.f32 %v568_v2, %v562_v63  ;;  %v418_v63 = vld [vmem:[#allocation4 + $0x10] sm:$0xff]  ;;  %v419_v2 = vld [vmem:[#allocation4 + $0x18] sm:$0xff] }
 0x29b   : > { %579 = vst.msk [vmem:[#allocation3 + $0x10] sm:$0xff] %vm309_vm1, %v575_v1 }
 0x29c   : > { %578 = vst.msk [vmem:[#allocation3 + $0x8] sm:$0xff] %vm309_vm1, %v574_v3  ;;  %v572_v5 = vpop.xlane.xlu0 %571 }
 0x29d   : > { %v576_v6 = vadd.f32 %v572_v5, %v564_v4  ;;  %v716_v19 = vpop.permute.xlu1 %715  ;;  %v417_v5 = vld [vmem:[#allocation4 + $0x8] sm:$0xff] }
 0x29e   : > { %v745_v11 = vld [vmem:[#allocation3] sm:$0xff]  ;;  %v733_v27 = vsub.f32 %v675_v20, %v716_v19 }
 0x29f   : > { %580 = vst.msk [vmem:[#allocation3 + $0x18] sm:$0xff] %vm309_vm1, %v576_v6 }
 0x2a0   : > { %v425_v8 = vpop.xlane.xlu0 %424  ;;  %v737_v34 = vmul.f32 1.442695, %v733_v27 }
 0x2a1   : > { %v432_v9 = vadd.f32 %v425_v8, %v416_v7  ;;  %v726_v22 = vpop.permute.xlu1 %725 }
 0x2a2   : > { %v747_v10 = vld [vmem:[#allocation3 + $0x10] sm:$0xff]  ;;  %v735_v24 = vsub.f32 %v685_v23, %v726_v22 }
 0x2a3   : > { %437 = vst.msk [vmem:[#allocation4] sm:$0xff] %vm309_vm1, %v432_v9  ;;  %761 = vperm.xlu0 %1072, %v747_v10   ;;  %v746_v13 = vld [vmem:[#allocation3 + $0x8] sm:$0xff] }
 0x2a4   : > { %v741_v26 = vmul.f32 1.442695, %v735_v24 }
 0x2a5   : > { %v731_v25 = vpop.permute.xlu1 %730 }
 0x2a6   : > { %v748_v12 = vld [vmem:[#allocation3 + $0x18] sm:$0xff]  ;;  %v736_v28 = vsub.f32 %v1044_v21, %v731_v25  ;;  %1102 = vpow2.f32 %v741_v26 }
 0x2a7   : > { %751 = vperm.xlu0 %1072, %v745_v11   ;;  %766 = vperm.xlu1 %1073, %v748_v12   ;;  %1104 = vpow2.f32 %v737_v34 }
 0x2a8   : > { %v721_v30 = vpop.permute.xlu0 %720  ;;  %v743_v32 = vmul.f32 1.442695, %v736_v28 }
 0x2a9   : > { %v734_v33 = vsub.f32 %v1041_v18, %v721_v30 }
 0x2aa   : > { %v802_v17 = vld [vmem:[#allocation4] sm:$0xff]  ;;  %1106 = vpow2.f32 %v743_v32 }
 0x2ab   : > { %756 = vperm.xlu1 %1073, %v746_v13   ;;  %v739_v39 = vmul.f32 1.442695, %v734_v33 }
 0x2ad   : > { %1108 = vpow2.f32 %v739_v39 }
 0x2b3   : > { %v1103_v35 = vpop.eup %1102 }
 0x2b4   : > { %v1105_v38 = vpop.eup %1104 }
 0x2b7   : > { %v1107_v40 = vpop.eup %1106 }
 0x2ba   : > { %v1109_v45 = vpop.eup %1108 }
 0x2c6   : > { %428 = vadd.xlane.f32.xlu0 %v422_v14 }
 0x2ca   : > { %430 = vadd.xlane.f32.xlu0 %v423_v15 }
 0x2cf   : > { %426 = vadd.xlane.f32.xlu1 %v421_v16 }
 0x2e0   : > { %808 = vperm.xlu1 %1073, %v802_v17  }
 0x31e   : > { %v762_v36 = vpop.permute.xlu0 %761 }
 0x31f   : > { %v771_v37 = vadd.f32 %v1103_v35, %v762_v36 }
 0x321   : > { %1110 = vlog2.f32 %v771_v37 }
 0x322   : > { %v752_v41 = vpop.permute.xlu0 %751  ;;  %v767_v42 = vpop.permute.xlu1 %766 }
 0x323   : > { %v769_v43 = vadd.f32 %v1105_v38, %v752_v41  ;;  %v772_v44 = vadd.f32 %v1107_v40, %v767_v42 }
 0x325   : > { %1112 = vlog2.f32 %v769_v43 }
 0x326   : > { %1114 = vlog2.f32 %v772_v44  ;;  %v757_v46 = vpop.permute.xlu1 %756 }
 0x327   : > { %v770_v47 = vadd.f32 %v1109_v45, %v757_v46 }
 0x329   : > { %1116 = vlog2.f32 %v770_v47 }
 0x32e   : > { %v1111_v49 = vpop.eup %1110 }
 0x32f   : > { %v778_v50 = vmul.f32 0.6931472, %v1111_v49 }
 0x331   : > { %v783_v51 = vsub.f32 %v735_v24, %v778_v50 }
 0x332   : > { %v1113_v52 = vpop.eup %1112 }
 0x333   : > { %v1115_v53 = vpop.eup %1114  ;;  %v790_v31 = vsel %vm787_vm12, %v783_v51, 0.0  ;;  %v774_v54 = vmul.f32 0.6931472, %v1113_v52 }
 0x334   : > { %796 = vadd.xlane.f32.xlu1 %v790_v31  ;;  %v780_v55 = vmul.f32 0.6931472, %v1115_v53 }
 0x335   : > { %v781_v56 = vsub.f32 %v733_v27, %v774_v54 }
 0x336   : > { %v1117_v57 = vpop.eup %1116  ;;  %v784_v58 = vsub.f32 %v736_v28, %v780_v55 }
 0x337   : > { %v788_v29 = vsel %vm787_vm12, %v781_v56, 0.0  ;;  %v776_v59 = vmul.f32 0.6931472, %v1117_v57 }
 0x338   : > { %v791_v60 = vsel %vm787_vm12, %v784_v58, 0.0  ;;  %792 = vadd.xlane.f32.xlu1 %v788_v29 }
 0x339   : > { %798 = vadd.xlane.f32.xlu0 %v791_v60  ;;  %v782_v61 = vsub.f32 %v734_v33, %v776_v59 }
 0x33b   : > { %v789_v62 = vsel %vm787_vm12, %v782_v61, 0.0 }
 0x33d   : > { %794 = vadd.xlane.f32.xlu0 %v789_v62 }
 0x34f   : > { %v429_v0 = vpop.xlane.xlu0 %428 }
 0x350   : > { %v434_v1 = vadd.f32 %v429_v0, %v418_v63 }
 0x352   : > { %439 = vst.msk [vmem:[#allocation4 + $0x10] sm:$0xff] %vm309_vm1, %v434_v1 }
 0x353   : > { %v431_v3 = vpop.xlane.xlu0 %430 }
 0x354   : > { %v435_v4 = vadd.f32 %v431_v3, %v419_v2 }
 0x356   : > { %440 = vst.msk [vmem:[#allocation4 + $0x18] sm:$0xff] %vm309_vm1, %v435_v4 }
 0x358   : > { %v427_v6 = vpop.xlane.xlu1 %426 }
 0x359   : > { %v433_v7 = vadd.f32 %v427_v6, %v417_v5  ;;  %v804_v8 = vld [vmem:[#allocation4 + $0x10] sm:$0xff] }
 0x35a   : > { %818 = vperm.xlu1 %1073, %v804_v8  }
 0x35b   : > { %438 = vst.msk [vmem:[#allocation4 + $0x8] sm:$0xff] %vm309_vm1, %v433_v7 }
 0x35c   : > { %v809_v11 = vpop.permute.xlu1 %808 }
 0x35d   : > { %v805_v9 = vld [vmem:[#allocation4 + $0x18] sm:$0xff]  ;;  %v826_v13 = vsel %vm801_vm13, %v809_v11, 0.0 }
 0x35e   : > { %823 = vperm.xlu1 %1073, %v805_v9  }
 0x362   : > { %v803_v10 = vld [vmem:[#allocation4 + $0x8] sm:$0xff] }
 0x363   : > { %813 = vperm.xlu0 %1072, %v803_v10  }
 0x3bd   : > { %v797_v12 = vpop.xlane.xlu1 %796 }
 0x3c1   : > { %v793_v14 = vpop.xlane.xlu1 %792 }
 0x3c2   : > { %v830_v15 = vsel %vm800_vm14, %v793_v14, %v826_v13  ;;  %v799_v16 = vpop.xlane.xlu0 %798 }
 0x3c3   : > { %834 = vst [vmem:[%s303_s7] sm:$0xff] %v830_v15 }
 0x3c6   : > { %v795_v21 = vpop.xlane.xlu0 %794 }
 0x3d5   : > { %v819_v17 = vpop.permute.xlu1 %818 }
 0x3d6   : > { %v828_v18 = vsel %vm801_vm13, %v819_v17, 0.0 }
 0x3d7   : > { %v832_v19 = vsel %vm800_vm14, %v797_v12, %v828_v18 }
 0x3d8   : > { %836 = vst [vmem:[%s303_s7 + $0x10] sm:$0xff] %v832_v19 }
 0x3d9   : > { %v824_v20 = vpop.permute.xlu1 %823 }
 0x3da   : > { %v829_v22 = vsel %vm801_vm13, %v824_v20, 0.0 }
 0x3db   : > { %v833_v23 = vsel %vm800_vm14, %v799_v16, %v829_v22 }
 0x3dc   : > { %837 = vst [vmem:[%s303_s7 + $0x18] sm:$0xff] %v833_v23 }
 0x3de   : > { %v814_v24 = vpop.permute.xlu0 %813 }
 0x3df   : > { %v827_v25 = vsel %vm801_vm13, %v814_v24, 0.0 }
 0x3e0   : > { %v831_v27 = vsel %vm800_vm14, %v795_v21, %v827_v25 }
 0x3e1   : > { %835 = vst [vmem:[%s303_s7 + $0x8] sm:$0xff] %v831_v27 }
 0x3e2 PF: > { %s15_s20 = sadd.s32 1, %s1140_s20   ;;  %s1408_s18 = smov %s1136_s19 }
 0x3e3   : > { %p12_p5 = scmp.ge.s32.totalorder %s15_s20, 4   ;;  %s1409_s19 = smov %s1411_s21 }
 0x3e5   :  { %14 = sbr.rel (!%p12_p5) target bundleno = 2 (0x2), region = 87 }

</bundles_post_ra>
